<compile_context>
chip_gen: v6e
topology: v6e:2x2x1
jax: 0.10.0
libtpu: 0.0.40
codegen_flags: <defaults>
</compile_context>

<pallas_src>
import functools

import jax
import jax.numpy as jnp
from jax.experimental import pallas as pl
from jax.experimental.pallas import tpu as pltpu

C = 512          # channel count fixed by the module
EPS = 1e-5       # PyTorch BatchNorm1d default eps


def _round_up(x, m):
    return ((x + m - 1) // m) * m


def _visual_conv1d_kernel(x_ref, xl_ref, xr_ref, prm_ref, wpw_ref, alpha_ref,
                          o_ref, *, t_valid):
    """Processes one (t_tile, C) time-tile of one batch element.

    prm_ref rows: 0:s1 1:b1 2:w0 3:w1 4:w2 5:s2 6:b2 (row 7 = padding).
    xl_ref / xr_ref: raw input row just before / after this tile (1-row halo).
    """
    t_tile = x_ref.shape[0]
    i = pl.program_id(1)                       # time-tile index

    s1 = prm_ref[0:1, :]
    b1 = prm_ref[1:2, :]
    w0 = prm_ref[2:3, :]
    w1 = prm_ref[3:4, :]
    w2 = prm_ref[4:5, :]
    s2 = prm_ref[5:6, :]
    b2 = prm_ref[6:7, :]
    alpha = alpha_ref[0, 0]                    # PReLU scalar from SMEM

    x = x_ref[...]                             # (t_tile, C) f32

    def relu_bn1(v):
        return jnp.maximum(v, 0.0) * s1 + b1

    h = relu_bn1(x)

    ridx = jax.lax.broadcasted_iota(jnp.int32, (t_tile, 1), 0)
    # Zero rows beyond the true sequence length so the k=3 conv sees the same
    # zero padding as the unpadded op (traced only when T % t_tile != 0).
    if t_valid % t_tile != 0:
        h = jnp.where(ridx + i * t_tile < t_valid, h, 0.0)

    # Halo rows, passed through the same ReLU+BN1; zeroed at the true sequence
    # edges to reproduce Conv1d's zero padding of the BN output.
    hl = jnp.where(i > 0, relu_bn1(xl_ref[...]), 0.0)                     # (1,C)
    hr = jnp.where((i + 1) * t_tile < t_valid, relu_bn1(xr_ref[...]), 0.0)

    # Depthwise Conv1d k=3, pad=1: neighbors via XLU sublane rolls, with the
    # single wrapped row of each roll replaced by the halo row.
    left = pltpu.roll(h, shift=1, axis=0)             # left[t]  = h[t-1]
    left = jnp.where(ridx == 0, hl, left)
    right = pltpu.roll(h, shift=t_tile - 1, axis=0)   # right[t] = h[t+1]
    right = jnp.where(ridx == t_tile - 1, hr, right)
    y = w0 * left + w1 * h + w2 * right

    # PReLU (single shared alpha), then BatchNorm1d #2 (folded, inference).
    y = jnp.where(y > 0, y, alpha * y)
    z = y * s2 + b2

    # Pointwise 1x1 conv on the MXU: bf16 operands, f32 accumulation.
    out = jnp.dot(z.astype(jnp.bfloat16), wpw_ref[...],
                  preferred_element_type=jnp.float32)

    # Residual add in f32.
    o_ref[...] = (out + x).astype(o_ref.dtype)


def visual_conv1d(x_nct, params, *, t_tile_max=256):
    """x_nct: (N, 512, T) float32 (PyTorch NCT layout). Returns (N, 512, T)."""
    prm, alpha, wpw_bf16 = params
    N, Cc, T = x_nct.shape
    assert Cc == C

    # TODO(synk): NCT-native kernel would remove these two HBM transposes.
    x_ntc = jnp.transpose(x_nct, (0, 2, 1)).astype(jnp.float32)   # (N, T, C)

    # Time tile: multiple of 8 sublanes; 256 fills the MXU M dim on v6e/v7x
    # (use t_tile_max=128 on v5e if desired).  Small T collapses to one tile.
    t_tile = min(t_tile_max, _round_up(T, 8))
    n_t = pl.cdiv(T, t_tile)
    t_pad = n_t * t_tile
    if t_pad != T:
        x_ntc = jnp.pad(x_ntc, ((0, 0), (0, t_pad - T), (0, 0)))

    # 1-row halos (raw x rows just outside each tile); kernel applies ReLU+BN1
    # and zeroes them at the true sequence edges.
    zero_row = jnp.zeros((N, 1, C), jnp.float32)
    xl = jnp.concatenate(
        [zero_row, x_ntc[:, t_tile - 1:t_pad - 1:t_tile, :]], axis=1)
    xr = jnp.concatenate(
        [x_ntc[:, t_tile:t_pad:t_tile, :], zero_row], axis=1)
    xl = xl.reshape(N * n_t, 1, C)
    xr = xr.reshape(N * n_t, 1, C)

    halo_spec = pl.BlockSpec((None, 1, C), lambda n, i: (n * n_t + i, 0, 0))

    out = pl.pallas_call(
        functools.partial(_visual_conv1d_kernel, t_valid=T),
        out_shape=jax.ShapeDtypeStruct((N, t_pad, C), jnp.float32),
        grid=(N, n_t),
        in_specs=[
            pl.BlockSpec((None, t_tile, C), lambda n, i: (n, i, 0)),   # x tile
            halo_spec,                                                 # left halo
            halo_spec,                                                 # right halo
            pl.BlockSpec((8, C), lambda n, i: (0, 0)),                 # packed per-channel params
            pl.BlockSpec((C, C), lambda n, i: (0, 0)),                 # pw weight^T (bf16)
            pl.BlockSpec((1, 1), lambda n, i: (0, 0),
                         memory_space=pltpu.MemorySpace.SMEM),         # prelu alpha
        ],
        out_specs=pl.BlockSpec((None, t_tile, C), lambda n, i: (n, i, 0)),
        compiler_params=pltpu.CompilerParams(
            dimension_semantics=("parallel", "parallel"),
            vmem_limit_bytes=48 * 1024 * 1024),
    )(x_ntc, xl, xr, prm, wpw_bf16, alpha)

    out = out[:, :T, :]
    return jnp.transpose(out, (0, 2, 1))                 # back to (N, C, T)


def make_params(key):
    """Deterministic synthetic parameters matching the module's shapes."""
    ks = jax.random.split(key, 8)
    # BatchNorm1d #1 (folded inference scale/shift)
    gamma1 = 1.0 + 0.1 * jax.random.normal(ks[0], (C,), jnp.float32)
    beta1 = 0.1 * jax.random.normal(ks[1], (C,), jnp.float32)
    mean1 = 0.05 * jax.random.normal(ks[2], (C,), jnp.float32)
    var1 = 1.0 + 0.1 * jnp.abs(jax.random.normal(ks[3], (C,), jnp.float32))
    s1 = gamma1 / jnp.sqrt(var1 + EPS)
    b1 = beta1 - mean1 * s1
    # Depthwise Conv1d weight: (C, 1, 3) -> three (C,) taps
    w_dw = 0.2 * jax.random.normal(ks[4], (C, 3), jnp.float32)
    w0, w1, w2 = w_dw[:, 0], w_dw[:, 1], w_dw[:, 2]
    # PReLU (default init 0.25, single shared parameter)
    alpha = jnp.full((1, 1), 0.25, jnp.float32)
    # BatchNorm1d #2 (running_mean=0, running_var=1)
    gamma2 = 1.0 + 0.1 * jax.random.normal(ks[5], (C,), jnp.float32)
    beta2 = 0.1 * jax.random.normal(ks[6], (C,), jnp.float32)
    s2 = gamma2 / jnp.sqrt(1.0 + EPS)
    b2 = beta2
    # Pointwise Conv1d weight: (Cout, Cin, 1) -> pass W^T (Cin, Cout) in bf16
    w_pw = (1.0 / jnp.sqrt(C)) * jax.random.normal(ks[7], (C, C), jnp.float32)
    wpw_t = w_pw.T
    # Pack the seven per-channel vectors into one (8, C) array (row 7 = pad).
    packed = jnp.zeros((8, C), jnp.float32)
    packed = packed.at[:7, :].set(jnp.stack([s1, b1, w0, w1, w2, s2, b2], 0))
    return packed, alpha, wpw_t.astype(jnp.bfloat16)


def ref_forward(x_nct, params, *, matmul_bf16=True):
    """Pure-JAX reference (same math, (N,T,C) layout)."""
    prm, alpha, wpw_bf16 = params
    s1, b1, w0, w1, w2, s2, b2 = [prm[k:k + 1, :] for k in range(7)]
    x = jnp.transpose(x_nct, (0, 2, 1))               # (N, T, C)
    h = jnp.maximum(x, 0.0) * s1 + b1
    hp = jnp.pad(h, ((0, 0), (1, 1), (0, 0)))
    y = w0 * hp[:, :-2, :] + w1 * hp[:, 1:-1, :] + w2 * hp[:, 2:, :]
    y = jnp.where(y > 0, y, alpha[0, 0] * y)
    z = y * s2 + b2
    if matmul_bf16:
        out = jnp.einsum("ntc,cd->ntd", z.astype(jnp.bfloat16), wpw_bf16,
                         preferred_element_type=jnp.float32)
    else:
        out = jnp.einsum("ntc,cd->ntd", z, wpw_bf16.astype(jnp.float32),
                         preferred_element_type=jnp.float32)
    out = out + x
    return jnp.transpose(out, (0, 2, 1))


if __name__ == "__main__":
    key = jax.random.PRNGKey(0)
    k_x, k_p = jax.random.split(key)
    N, T = 2, 40                                      # channels fixed at 512
    x = jax.random.normal(k_x, (N, C, T), jnp.float32)
    params = make_params(k_p)

    # Small tile to exercise the multi-tile path (halo rows + padding mask),
    # plus the default (single-tile here) path.
    out_tiled = visual_conv1d(x, params, t_tile_max=16)
    out_full = visual_conv1d(x, params)
    jax.block_until_ready((out_tiled, out_full))

    ref_bf16 = ref_forward(x, params, matmul_bf16=True)
    ref_f32 = ref_forward(x, params, matmul_bf16=False)

    assert out_tiled.shape == (N, C, T)
    assert jnp.allclose(out_tiled, ref_bf16, atol=1e-3, rtol=1e-3), \
        "tiled kernel mismatch vs bf16-matmul reference"
    assert jnp.allclose(out_full, ref_bf16, atol=1e-3, rtol=1e-3), \
        "single-tile kernel mismatch vs bf16-matmul reference"
    assert jnp.allclose(out_tiled, ref_f32, atol=3e-2, rtol=3e-2), \
        "kernel mismatch vs full-f32 reference"
    print("KERNEL_OK")
</pallas_src>

<mosaic_0001>
module attributes {stable_mosaic.version = 11 : i64} {
  func.func @_visual_conv1d_kernel(%arg0: i32, %arg1: i32, %arg2: memref<1x16x512xf32, #tpu.memory_space<vmem>>, %arg3: memref<1x1x512xf32, #tpu.memory_space<vmem>>, %arg4: memref<1x1x512xf32, #tpu.memory_space<vmem>>, %arg5: memref<8x512xf32, #tpu.memory_space<vmem>>, %arg6: memref<512x512xbf16, #tpu.memory_space<vmem>>, %arg7: memref<1x1xf32, #tpu.memory_space<smem>>, %arg8: memref<1x16x512xf32, #tpu.memory_space<vmem>>) attributes {dimension_semantics = [#tpu.dimension_semantics<parallel>, #tpu.dimension_semantics<parallel>], iteration_bounds = array<i64: 2, 3>, scalar_prefetch = 0 : i64, scratch_operands = 0 : i64, tpu.core_type = #tpu.core_type<tc>, window_params = [{transform_indices = @transform_0, window_bounds = array<i64: 1, 16, 512>}, {transform_indices = @transform_1, window_bounds = array<i64: 1, 1, 512>}, {transform_indices = @transform_2, window_bounds = array<i64: 1, 1, 512>}, {pipeline_mode = #tpu.pipeline_mode<synchronous>, transform_indices = @transform_3, window_bounds = array<i64: 8, 512>}, {pipeline_mode = #tpu.pipeline_mode<synchronous>, transform_indices = @transform_4, window_bounds = array<i64: 512, 512>}, {transform_indices = @transform_5, window_bounds = array<i64: 1, 1>}, {transform_indices = @transform_6, window_bounds = array<i64: 1, 16, 512>}]} {
    %c0 = arith.constant 0 : index
    %c0_0 = arith.constant 0 : index
    %0 = vector.load %arg5[%c0, %c0_0] : memref<8x512xf32, #tpu.memory_space<vmem>>, vector<1x512xf32>
    %c1 = arith.constant 1 : index
    %c0_1 = arith.constant 0 : index
    %1 = vector.load %arg5[%c1, %c0_1] : memref<8x512xf32, #tpu.memory_space<vmem>>, vector<1x512xf32>
    %c2 = arith.constant 2 : index
    %c0_2 = arith.constant 0 : index
    %2 = vector.load %arg5[%c2, %c0_2] : memref<8x512xf32, #tpu.memory_space<vmem>>, vector<1x512xf32>
    %c3 = arith.constant 3 : index
    %c0_3 = arith.constant 0 : index
    %3 = vector.load %arg5[%c3, %c0_3] : memref<8x512xf32, #tpu.memory_space<vmem>>, vector<1x512xf32>
    %c4 = arith.constant 4 : index
    %c0_4 = arith.constant 0 : index
    %4 = vector.load %arg5[%c4, %c0_4] : memref<8x512xf32, #tpu.memory_space<vmem>>, vector<1x512xf32>
    %c5 = arith.constant 5 : index
    %c0_5 = arith.constant 0 : index
    %5 = vector.load %arg5[%c5, %c0_5] : memref<8x512xf32, #tpu.memory_space<vmem>>, vector<1x512xf32>
    %c6 = arith.constant 6 : index
    %c0_6 = arith.constant 0 : index
    %6 = vector.load %arg5[%c6, %c0_6] : memref<8x512xf32, #tpu.memory_space<vmem>>, vector<1x512xf32>
    %c0_7 = arith.constant 0 : index
    %c0_8 = arith.constant 0 : index
    %7 = memref.load %arg7[%c0_7, %c0_8] : memref<1x1xf32, #tpu.memory_space<smem>>
    %c0_9 = arith.constant 0 : index
    %c0_10 = arith.constant 0 : index
    %c0_11 = arith.constant 0 : index
    %8 = vector.load %arg2[%c0_9, %c0_10, %c0_11] : memref<1x16x512xf32, #tpu.memory_space<vmem>>, vector<1x16x512xf32>
    %9 = vector.shape_cast %8 : vector<1x16x512xf32> to vector<16x512xf32>
    %cst = arith.constant 0.000000e+00 : f32
    %10 = vector.broadcast %cst : f32 to vector<16x512xf32>
    %11 = arith.maximumf %9, %10 : vector<16x512xf32>
    %12 = vector.broadcast %0 : vector<1x512xf32> to vector<16x512xf32>
    %13 = arith.mulf %11, %12 : vector<16x512xf32>
    %14 = vector.broadcast %1 : vector<1x512xf32> to vector<16x512xf32>
    %15 = arith.addf %13, %14 : vector<16x512xf32>
    %16 = tpu.iota {dimensions = array<i32: 0>} : vector<16x1xi32>
    %c16_i32 = arith.constant 16 : i32
    %17 = arith.muli %arg1, %c16_i32 : i32
    %18 = vector.broadcast %17 : i32 to vector<16x1xi32>
    %19 = arith.addi %16, %18 : vector<16x1xi32>
    %c40_i32 = arith.constant 40 : i32
    %20 = vector.broadcast %c40_i32 : i32 to vector<16x1xi32>
    %21 = arith.cmpi slt, %19, %20 : vector<16x1xi32>
    %cst_12 = arith.constant 0.000000e+00 : f32
    %22 = vector.shape_cast %21 : vector<16x1xi1> to vector<16x1xi1>
    %23 = vector.broadcast %22 : vector<16x1xi1> to vector<16x512xi1>
    %24 = vector.broadcast %cst_12 : f32 to vector<16x512xf32>
    %25 = arith.select %23, %15, %24 : vector<16x512xi1>, vector<16x512xf32>
    %c0_i32 = arith.constant 0 : i32
    %26 = arith.cmpi sgt, %arg1, %c0_i32 : i32
    %c0_13 = arith.constant 0 : index
    %c0_14 = arith.constant 0 : index
    %c0_15 = arith.constant 0 : index
    %27 = vector.load %arg3[%c0_13, %c0_14, %c0_15] : memref<1x1x512xf32, #tpu.memory_space<vmem>>, vector<1x1x512xf32>
    %28 = vector.shape_cast %27 : vector<1x1x512xf32> to vector<1x512xf32>
    %cst_16 = arith.constant 0.000000e+00 : f32
    %29 = vector.broadcast %cst_16 : f32 to vector<1x512xf32>
    %30 = arith.maximumf %28, %29 : vector<1x512xf32>
    %31 = arith.mulf %30, %0 : vector<1x512xf32>
    %32 = arith.addf %31, %1 : vector<1x512xf32>
    %cst_17 = arith.constant 0.000000e+00 : f32
    %33 = vector.broadcast %cst_17 : f32 to vector<1x512xf32>
    %34 = arith.select %26, %32, %33 : vector<1x512xf32>
    %c1_i32 = arith.constant 1 : i32
    %35 = arith.addi %arg1, %c1_i32 : i32
    %c16_i32_18 = arith.constant 16 : i32
    %36 = arith.muli %35, %c16_i32_18 : i32
    %c40_i32_19 = arith.constant 40 : i32
    %37 = arith.cmpi slt, %36, %c40_i32_19 : i32
    %c0_20 = arith.constant 0 : index
    %c0_21 = arith.constant 0 : index
    %c0_22 = arith.constant 0 : index
    %38 = vector.load %arg4[%c0_20, %c0_21, %c0_22] : memref<1x1x512xf32, #tpu.memory_space<vmem>>, vector<1x1x512xf32>
    %39 = vector.shape_cast %38 : vector<1x1x512xf32> to vector<1x512xf32>
    %cst_23 = arith.constant 0.000000e+00 : f32
    %40 = vector.broadcast %cst_23 : f32 to vector<1x512xf32>
    %41 = arith.maximumf %39, %40 : vector<1x512xf32>
    %42 = arith.mulf %41, %0 : vector<1x512xf32>
    %43 = arith.addf %42, %1 : vector<1x512xf32>
    %cst_24 = arith.constant 0.000000e+00 : f32
    %44 = vector.broadcast %cst_24 : f32 to vector<1x512xf32>
    %45 = arith.select %37, %43, %44 : vector<1x512xf32>
    %c1_i32_25 = arith.constant 1 : i32
    %46 = tpu.dynamic_rotate %25 by %c1_i32_25 dim 0 : vector<16x512xf32>, i32 -> vector<16x512xf32>
    %c0_i32_26 = arith.constant 0 : i32
    %47 = vector.broadcast %c0_i32_26 : i32 to vector<16x1xi32>
    %48 = arith.cmpi eq, %16, %47 : vector<16x1xi32>
    %49 = vector.shape_cast %48 : vector<16x1xi1> to vector<16x1xi1>
    %50 = vector.broadcast %49 : vector<16x1xi1> to vector<16x512xi1>
    %51 = vector.shape_cast %34 : vector<1x512xf32> to vector<1x512xf32>
    %52 = vector.broadcast %51 : vector<1x512xf32> to vector<16x512xf32>
    %53 = arith.select %50, %52, %46 : vector<16x512xi1>, vector<16x512xf32>
    %c15_i32 = arith.constant 15 : i32
    %54 = tpu.dynamic_rotate %25 by %c15_i32 dim 0 : vector<16x512xf32>, i32 -> vector<16x512xf32>
    %c15_i32_27 = arith.constant 15 : i32
    %55 = vector.broadcast %c15_i32_27 : i32 to vector<16x1xi32>
    %56 = arith.cmpi eq, %16, %55 : vector<16x1xi32>
    %57 = vector.shape_cast %56 : vector<16x1xi1> to vector<16x1xi1>
    %58 = vector.broadcast %57 : vector<16x1xi1> to vector<16x512xi1>
    %59 = vector.shape_cast %45 : vector<1x512xf32> to vector<1x512xf32>
    %60 = vector.broadcast %59 : vector<1x512xf32> to vector<16x512xf32>
    %61 = arith.select %58, %60, %54 : vector<16x512xi1>, vector<16x512xf32>
    %62 = vector.broadcast %2 : vector<1x512xf32> to vector<16x512xf32>
    %63 = arith.mulf %62, %53 : vector<16x512xf32>
    %64 = vector.broadcast %3 : vector<1x512xf32> to vector<16x512xf32>
    %65 = arith.mulf %64, %25 : vector<16x512xf32>
    %66 = arith.addf %63, %65 : vector<16x512xf32>
    %67 = vector.broadcast %4 : vector<1x512xf32> to vector<16x512xf32>
    %68 = arith.mulf %67, %61 : vector<16x512xf32>
    %69 = arith.addf %66, %68 : vector<16x512xf32>
    %cst_28 = arith.constant 0.000000e+00 : f32
    %70 = vector.broadcast %cst_28 : f32 to vector<16x512xf32>
    %71 = arith.cmpf ogt, %69, %70 : vector<16x512xf32>
    %72 = vector.broadcast %7 : f32 to vector<16x512xf32>
    %73 = arith.mulf %72, %69 : vector<16x512xf32>
    %74 = arith.select %71, %69, %73 : vector<16x512xi1>, vector<16x512xf32>
    %75 = vector.broadcast %5 : vector<1x512xf32> to vector<16x512xf32>
    %76 = arith.mulf %74, %75 : vector<16x512xf32>
    %77 = vector.broadcast %6 : vector<1x512xf32> to vector<16x512xf32>
    %78 = arith.addf %76, %77 : vector<16x512xf32>
    %79 = arith.truncf %78 : vector<16x512xf32> to vector<16x512xbf16>
    %c0_29 = arith.constant 0 : index
    %c0_30 = arith.constant 0 : index
    %80 = vector.load %arg6[%c0_29, %c0_30] : memref<512x512xbf16, #tpu.memory_space<vmem>>, vector<512x512xbf16>
    %cst_31 = arith.constant dense<0.000000e+00> : vector<16x512xf32>
    %81 = tpu.matmul %79, %80, %cst_31 {dimension_numbers = #tpu.dot_dimension_numbers<[1], [0], [0], [1], [0, 0, 1, 1], [], []>} : vector<16x512xbf16>, vector<512x512xbf16>, vector<16x512xf32> -> vector<16x512xf32>
    %82 = arith.addf %81, %9 : vector<16x512xf32>
    %c0_32 = arith.constant 0 : index
    %c0_33 = arith.constant 0 : index
    %c0_34 = arith.constant 0 : index
    %83 = vector.load %arg8[%c0_32, %c0_33, %c0_34] : memref<1x16x512xf32, #tpu.memory_space<vmem>>, vector<1x16x512xf32>
    %84 = vector.shape_cast %83 : vector<1x16x512xf32> to vector<16x512xf32>
    %85 = vector.shape_cast %82 : vector<16x512xf32> to vector<1x16x512xf32>
    tpu.vector_store %arg8[%c0_32, %c0_33, %c0_34], %85 {strides = array<i32>} : memref<1x16x512xf32, #tpu.memory_space<vmem>>, vector<1x16x512xf32>,
    return
  }
  func.func @transform_0(%arg0: i32, %arg1: i32) -> (i32, i32, i32) {
    %c0_i32 = arith.constant 0 : i32
    %c0_i32_0 = arith.constant 0 : i32
    return %arg0, %arg1, %c0_i32 : i32, i32, i32
  }
  func.func @transform_1(%arg0: i32, %arg1: i32) -> (i32, i32, i32) {
    %c3_i32 = arith.constant 3 : i32
    %0 = arith.muli %arg0, %c3_i32 : i32
    %1 = arith.addi %0, %arg1 : i32
    %c0_i32 = arith.constant 0 : i32
    %c0_i32_0 = arith.constant 0 : i32
    %c0_i32_1 = arith.constant 0 : i32
    return %1, %c0_i32, %c0_i32_0 : i32, i32, i32
  }
  func.func @transform_2(%arg0: i32, %arg1: i32) -> (i32, i32, i32) {
    %c3_i32 = arith.constant 3 : i32
    %0 = arith.muli %arg0, %c3_i32 : i32
    %1 = arith.addi %0, %arg1 : i32
    %c0_i32 = arith.constant 0 : i32
    %c0_i32_0 = arith.constant 0 : i32
    %c0_i32_1 = arith.constant 0 : i32
    return %1, %c0_i32, %c0_i32_0 : i32, i32, i32
  }
  func.func @transform_3(%arg0: i32, %arg1: i32) -> (i32, i32) {
    %c0_i32 = arith.constant 0 : i32
    %c0_i32_0 = arith.constant 0 : i32
    %c0_i32_1 = arith.constant 0 : i32
    return %c0_i32, %c0_i32_0 : i32, i32
  }
  func.func @transform_4(%arg0: i32, %arg1: i32) -> (i32, i32) {
    %c0_i32 = arith.constant 0 : i32
    %c0_i32_0 = arith.constant 0 : i32
    %c0_i32_1 = arith.constant 0 : i32
    return %c0_i32, %c0_i32_0 : i32, i32
  }
  func.func @transform_5(%arg0: i32, %arg1: i32) -> (i32, i32) {
    %c0_i32 = arith.constant 0 : i32
    %c0_i32_0 = arith.constant 0 : i32
    %c0_i32_1 = arith.constant 0 : i32
    return %c0_i32, %c0_i32_0 : i32, i32
  }
  func.func @transform_6(%arg0: i32, %arg1: i32) -> (i32, i32, i32) {
    %c0_i32 = arith.constant 0 : i32
    %c0_i32_0 = arith.constant 0 : i32
    return %arg0, %arg1, %c0_i32 : i32, i32, i32
  }
}

</mosaic_0001>

<bundles_post_ra>
// kernel: tpu_custom_call.1
= control target key start
LH: loop header
LB: loop body
LE: loop exit
PB: predicated region body
PF: predicated region fallthrough
CT: control target
= control target key end

     0   :  { %s3422_s0 = inlined_call_operand.hbm [shape: f32[2,48,512], index: 0, kind: input, shape index: {}]   ;;  %s3423_s1 = inlined_call_operand.hbm [shape: f32[6,1,512], index: 1, kind: input, shape index: {}]   ;;  %s3424_s2 = inlined_call_operand.hbm [shape: f32[6,1,512], index: 2, kind: input, shape index: {}]   ;;  %s3425_s3 = inlined_call_operand.hbm [shape: f32[8,512], index: 3, kind: input, shape index: {}]   ;;  %s3426_s4 = inlined_call_operand.hbm [shape: bf16[512,512], index: 4, kind: input, shape index: {}]   ;;  %s3427_s5 = inlined_call_operand.<no memory space> [shape: f32[1,1], index: 5, kind: input, shape index: {}]   ;;  %s3428_s6 = inlined_call_operand.hbm [shape: f32[2,48,512], index: 6, kind: output, shape index: {}]  }
   0x1   :  { %3455 = sst [smem:[#allocation32_spill]] %s3423_s1 }
   0x2   :  { %3456 = sst [smem:[#allocation33_spill]] %s3424_s2 }
   0x3   :  { %3457 = sst [smem:[#allocation34_spill]] %s3425_s3 }
   0x4   :  { %3458 = sst [smem:[#allocation35_spill]] %s3428_s6 }
   0x5   :  { %11 = sst [smem:[#allocation2]] %s3427_s5 }
   0x6   :  { %12 = vsyncpa [#allocation4], 0 }
   0x7   :  { %14 = vsyncpa [#allocation4 + $0x1], 0 }
   0x8   :  { %15 = vsyncpa [#allocation7], 0 }
   0x9   :  { %17 = vsyncpa [#allocation7 + $0x1], 0 }
   0xa   :  { %18 = vsyncpa [#allocation10], 0 }
   0xb   :  { %19 = vsyncpa [#allocation5], 0 }
   0xc   :  { %21 = vsyncpa [#allocation5 + $0x1], 0  ;;  %s2766_s23 = smov 0   ;;  %s2768_s24 = smov 0  }
   0xd   :  { %s2770_s25 = smov 0   ;;  %s2772_s26 = smov 0  }
   0xe   :  { %s2774_s27 = smov 0   ;;  %s2776_s28 = smov 0  }
   0xf   :  { %s2778_s5 = smov 0   ;;  %s2780_s29 = smov 0  }
  0x10   :  { %s2782_s30 = smov 0   ;;  %s2784_s7 = smov 0  }
  0x11   :  { %s2786_s8 = smov 0  }
  0x12 LB: > { %3459 = sst [smem:[#allocation17_spill]] %s2678_s24  ;;  %s2822_s9 = sadd.s32 4294967295, %s2714_s8   ;;  %s2714_s8 = sphi %s2786_s8, %s27_s8   ;;  %s2710_s7 = sphi %s2784_s7, %s3525_s7   ;;  %s2706_s30 = sphi %s2782_s30, %s3524_s30   ;;  %s2702_s29 = sphi %s2780_s29, %s3523_s29   ;;  %s2698_s5 = sphi %s2778_s5, %s3522_s5   ;;  %s2694_s28 = sphi %s2776_s28, %s3521_s28   ;;  %s2690_s27 = sphi %s2774_s27, %s3520_s27   ;;  %s2686_s26 = sphi %s2772_s26, %s3519_s26   ;;  %s2682_s25 = sphi %s2770_s25, %s3515_s25   ;;  %s2678_s24 = sphi %s2768_s24, %s3514_s24   ;;  %s2674_s23 = sphi %s2766_s23, %s3513_s23  }
  0x13   : > { %3460 = sst [smem:[#allocation18_spill]] %s2682_s25  ;;  %s1953_s10 = sadd.s32 4294967294, %s2714_s8  }
  0x14   : > { %3461 = sst [smem:[#allocation19_spill]] %s2686_s26  ;;  %p61_p0 = scmp.ne.s32.totalorder %s2690_s27, %s2686_s26 }
  0x15   : > { %3462 = sst [smem:[#allocation20_spill]] %s2698_s5  ;;  %p3439_p1 = scmp.eq.s32.totalorder %s2822_s9, 0 }
  0x16   : > { %3463 = sst [smem:[#allocation21_spill]] %s2702_s29  ;;  %p216_p3 = scmp.eq.s32.totalorder %s1953_s10, 5 }
  0x17   : > { %3464 = sst [smem:[#allocation22_spill]] %s2714_s8  ;;  %p2831_p4 = por %p3439_p1, %p61_p0 }
  0x18   : > { %3465 = sst [smem:[#allocation23_spill]] %s2822_s9  ;;  %p1954_p5 = scmp.ge.s32.totalorder %s2714_s8, 1 }
  0x19   : > { %s3466_s11 = scalar_select %p2831_p4, 1, 0 }
  0x1a   : > { %p2836_p6 = por %p216_p3, %p61_p0  ;;  %p223_p7 = scmp.lt.s32.totalorder %s2714_s8, 7 }
  0x1b   : > { %3467 = sst [smem:[#allocation24_spill]] %s3466_s11  ;;  %s2716_s14 = smov [#allocation9]  }
  0x1c   : > { %s3468_s12 = scalar_select %p2836_p6, 1, 0 }
  0x1d   : > { %p2841_p8 = pnand %p1954_p5, %p223_p7  ;;  %s236_s15 = sshll.u32 %s2716_s14, 4  ;;  %s237_s15 = int_to_ptr.vmem [resolvable:$true] %s236_s15 }
  0x1e   : > { %3469 = sst [smem:[#allocation25_spill]] %s3468_s12  ;;  %s2461_s17 = scalar_lea.vmem %s237_s15, 512 }
  0x1f   : > { %s3470_s13 = scalar_select %p2841_p8, 1, 0 }
  0x20   : > { %p2135_p9 = pneg %p2841_p8  ;;  %p2462_p12 = scmp.ne.s32.totalorder %s237_s15, %s2461_s17 }
  0x21   : > { %p2469_p3 = scmp.lt.s32.totalorder %s237_s15, %s237_s15  ;;  %p2470_p5 = scmp.lt.s32.totalorder %s2461_s17, %s2461_s17 }
  0x22   : > { %p2849_p10 = pnand %p2135_p9, %p3439_p1 }
  0x23   : > { %p2471_p7 = por %p2470_p5, %p2469_p3 }
  0x24   : > { %p3433_p11 = pneg %p2849_p10 }
  0x26   : > { %p2464_p13 = pnand %p2462_p12, %p3433_p11 }
  0x28   : > { %p2465_p0 = pneg %p2464_p13 }
  0x2a   : > { %p2472_p2 = pnand %p2471_p7, %p2465_p0 }
  0x2c   : > { %2475 = shalt.err (!%p2472_p2)
}
  0x2d   : > { %s3472_s3 = sld [smem:[#allocation34_spill]]  ;;  %s36_s20 = sadd.s32 1, %s2706_s30 }
  0x2e   : > { %p37_p2 = scmp.ge.s32.totalorder %s36_s20, 3  ;;  %s39_s21 = sadd.s32 1, %s2710_s7 }
  0x2f   : > { %s48_s22 = sadd.s32 1, %s2694_s28  ;;  %p55_p9 = scmp.ne.s32.totalorder %s2694_s28, %s2690_s27 }
  0x30   : > { %s3527_s20 = smov (%p37_p2, %s36_s20), 0  ;;  %s3529_s21 = smov (!%p37_p2, %s39_s21), %s2710_s7 }
  0x31   : > { %3473 = sst [smem:[#allocation26_spill]] %s3527_s20  ;;  %s44_s10 = ssub.s32 %s2706_s30, %s3527_s20 }
  0x32   : > { %p56_p12 = scmp.eq.s32.totalorder %s2714_s8, 0  ;;  %p41_p13 = scmp.ge.s32.totalorder %s3529_s21, 2 }
  0x33   : > { %2138 = dma.hbm_to_vmem [thread:$0]  (!%p2849_p10), %s3472_s3, 512, %s237_s15, [#allocation10]  }
  0x34   : > { %s71_s14 = smul.u32 3, %s2710_s7  ;;  %p2878_p0 = por %p56_p12, %p55_p9 }
  0x35   : > { %s78_s17 = sadd.s32 1, %s2682_s25  ;;  %s3531_s21 = smov (%p41_p13, %s3529_s21), 0 }
  0x36   : > { %3475 = sst [smem:[#allocation27_spill]] %s3531_s21  ;;  %s72_s18 = sadd.s32 %s2706_s30, %s71_s14 }
  0x37   : > { %p85_p3 = scmp.ne.s32.totalorder %s2682_s25, %s2678_s24  ;;  %s43_s19 = ssub.s32 %s2710_s7, %s3531_s21 }
  0x38   : > { %s73_s3 = smul.u32 3, %s3531_s21  ;;  %s45_s12 = sor.u32 %s44_s10, %s43_s19 }
  0x39   : > { %p2891_p5 = por %p85_p3, %p56_p12  ;;  %p46_p7 = scmp.eq.s32.totalorder %s45_s12, 0 }
  0x3a   : > { %s74_s6 = sadd.s32 %s73_s3, %s3527_s20  ;;  %p91_p2 = scmp.ne.s32.totalorder %s2678_s24, %s2674_s23 }
  0x3b   : > { %s75_s29 = ssub.s32 %s72_s18, %s74_s6  ;;  %p3480_p6 = scmp.eq.s32.totalorder %s2822_s9, 5 }
  0x3c   : > { %s2899_s5 = scalar_select %p46_p7, %s2694_s28, %s48_s22  }
  0x3d   : > { %p76_p13 = scmp.eq.s32.totalorder %s75_s29, 0  ;;  %p2903_p11 = por %p91_p2, %p3439_p1 }
  0x3e   : > { %3477 = sst [smem:[#allocation28_spill]] %s2899_s5  ;;  %p2912_p4 = por %p3480_p6, %p55_p9 }
  0x3f   : > { %s3478_s14 = scalar_select %p2903_p11, 1, 0 }
  0x40   : > { %s3481_s10 = scalar_select %p2912_p4, 1, 0 }
  0x41   : > { %3479 = sst [smem:[#allocation29_spill]] %s3478_s14  ;;  %p2158_p12 = scmp.lt.s32.totalorder %s2714_s8, 6 }
  0x42   : > { %3482 = sst [smem:[#allocation30_spill]] %s3481_s10  ;;  %s287_s6 = sand.u32 1, %s2714_s8  }
  0x43   : > { %s2918_s12 = scalar_select %p76_p13, %s2682_s25, %s78_s17  }
  0x44   : > { %p2922_p3 = pnand %p2158_p12, %p2878_p0  ;;  %s289_s23 = sand.u32 1, %s2682_s25  }
  0x45   : > { %3483 = sst [smem:[#allocation31_spill]] %s2918_s12  ;;  %s2928_s29 = sshll.u32 %s289_s23, 2 }
  0x46   : > { %s3484_s3 = scalar_select %p2922_p3, 1, 0 }
  0x47   : > { %s2112_s22 = sshll.u32 %s72_s18, 6  ;;  %s3485_s1 = sld [smem:[#allocation32_spill]] }
  0x48   : > { %s291_s5 = scalar_lea.vmem [#allocation6], %s2928_s29  ;;  %p2936_p6 = pnand %p2158_p12, %p2891_p5 }
  0x49   : > { %s301_s10 = sshll.u32 %s291_s5, 4  ;;  %s3487_s2 = sld [smem:[#allocation33_spill]]  ;;  %s302_s10 = int_to_ptr.vmem [resolvable:$true] %s301_s10 }
  0x4a   : > { %s2945_s18 = scalar_lea.sflag [#allocation7], %s287_s6  ;;  %p3440_p9 = pneg %p2936_p6 }
  0x4b   : > { %s2489_s21 = scalar_lea.vmem %s302_s10, 64  ;;  %s2717_s26 = smov [#allocation6]  }
  0x4c   : > { %p2490_p0 = scmp.ne.s32.totalorder %s302_s10, %s2489_s21  ;;  %s2494_s5 = sshll.u32 %s2717_s26, 4  ;;  %s2495_s5 = int_to_ptr.vmem [resolvable:$false] %s2494_s5 }
  0x4d   : > { %s299_s20 = scalar_lea.hbm %s3485_s1, %s2112_s22  ;;  %s2496_s19 = scalar_lea.vmem %s2495_s5, 128 }
  0x4e   : > { %p2492_p7 = pnand %p2490_p0, %p3440_p9  ;;  %p2497_p2 = scmp.lt.s32.totalorder %s302_s10, %s2495_s5 }
  0x4f   : > { %s2943_s23 = scalar_lea.hbm %s3487_s2, %s2112_s22  ;;  %p2498_p13 = scmp.lt.s32.totalorder %s2496_s19, %s2489_s21 }
  0x50   : > { %p2493_p5 = pneg %p2492_p7 }
  0x51   : > { %p2499_p12 = por %p2498_p13, %p2497_p2 }
  0x53   : > { %p2500_p1 = pnand %p2499_p12, %p2493_p5 }
  0x55   : > { %2503 = shalt.err (!%p2500_p1)
}
  0x56   : > { %2148 = dma.hbm_to_vmem [thread:$0]  (!%p2936_p6), %s299_s20, 64, %s302_s10, %s2945_s18  }
  0x57   : > { %s2718_s12 = smov [#allocation11]   ;;  %p3488_p7 = pneg %p2849_p10 }
  0x58   : > { %s246_s6 = sshll.u32 %s2718_s12, 4  ;;  %s247_s6 = int_to_ptr.vmem [resolvable:$true] %s246_s6 }
  0x59   : > { %s2515_s22 = scalar_lea.vmem %s247_s6, 16384  ;;  %p2523_p11 = scmp.lt.s32.totalorder %s247_s6, %s247_s6 }
  0x5a   : > { %p2516_p0 = scmp.ne.s32.totalorder %s247_s6, %s2515_s22  ;;  %p2524_p8 = scmp.lt.s32.totalorder %s2515_s22, %s2515_s22 }
  0x5c   : > { %p2518_p9 = pnand %p2516_p0, %p3488_p7  ;;  %p2525_p3 = por %p2524_p8, %p2523_p11 }
  0x5e   : > { %p2519_p4 = pneg %p2518_p9 }
  0x60   : > { %p2526_p2 = pnand %p2525_p3, %p2519_p4 }
  0x62   : > { %2529 = shalt.err (!%p2526_p2)
}
  0x63   : > { %s2719_s17 = smov 256   ;;  %s2720_s20 = smov 16  }
  0x64   : > { %2141 = dma.hbm_to_vmem [thread:$0]  (!%p2849_p10), %s3426_s4, 16384, %s247_s6, [#allocation10], %s2719_s17, %s2719_s17, %s2720_s20  }
  0x65   : > { %s263_s26 = sand.u32 1, %s2694_s28   ;;  %s2111_s5 = sshll.u32 %s2706_s30, 3 }
  0x66   : > { %s1958_s19 = sshll.u32 %s263_s26, 6  ;;  %s2117_s12 = smul.u32 24, %s2710_s7 }
  0x67   : > { %s267_s22 = scalar_lea.vmem [#allocation3], %s1958_s19  ;;  %s312_s9 = scalar_lea.vmem [#allocation8], %s2928_s29 }
  0x68   : > { %s277_s1 = sshll.u32 %s267_s22, 4  ;;  %s274_s2 = sadd.s32 %s2117_s12, %s2111_s5  ;;  %s278_s1 = int_to_ptr.vmem [resolvable:$true] %s277_s1 }
  0x69   : > { %s1961_s25 = sshll.u32 %s274_s2, 7  ;;  %s322_s11 = sshll.u32 %s312_s9, 4  ;;  %s323_s11 = int_to_ptr.vmem [resolvable:$true] %s322_s11 }
  0x6a   : > { %s276_s24 = scalar_lea.hbm %s3422_s0, %s1961_s25  ;;  %s264_s16 = scalar_lea.sflag [#allocation4], %s263_s26 }
  0x6b   : > { %p3489_p1 = scmp.ne.s32.totalorder %s3484_s3, 0  ;;  %s2543_s10 = scalar_lea.vmem %s278_s1, 1024 }
  0x6c   : > { %p2544_p8 = scmp.ne.s32.totalorder %s278_s1, %s2543_s10  ;;  %s2721_s6 = smov [#allocation3]  }
  0x6d   : > { %p2532_p4 = pneg %p3489_p1  ;;  %s2548_s17 = sshll.u32 %s2721_s6, 4  ;;  %s2549_s17 = int_to_ptr.vmem [resolvable:$false] %s2548_s17 }
  0x6e   : > { %s2550_s20 = scalar_lea.vmem %s2549_s17, 2048  ;;  %p2551_p3 = scmp.lt.s32.totalorder %s278_s1, %s2549_s17 }
  0x6f   : > { %p2546_p10 = pnand %p2544_p8, %p2532_p4  ;;  %p2552_p9 = scmp.lt.s32.totalorder %s2550_s20, %s2543_s10 }
  0x71   : > { %p2547_p11 = pneg %p2546_p10  ;;  %p2553_p5 = por %p2552_p9, %p2551_p3 }
  0x73   : > { %p2554_p13 = pnand %p2553_p5, %p2547_p11 }
  0x75   : > { %2557 = shalt.err (!%p2554_p13)
}
  0x76   : > { %s2722_s2 = smov 512   ;;  %s2723_s25 = smov 32  }
  0x77   : > { %2145 = dma.hbm_to_vmem [thread:$0]  (!%p3489_p1), %s276_s24, 1024, %s278_s1, %s264_s16, %s2722_s2, %s2722_s2, %s2723_s25  }
  0x78   : > { %s2571_s8 = scalar_lea.vmem %s323_s11, 64  ;;  %p3490_p0 = pneg %p2936_p6 }
  0x79   : > { %p2572_p12 = scmp.ne.s32.totalorder %s323_s11, %s2571_s8  ;;  %s2724_s9 = smov [#allocation8]  }
  0x7a   : > { %s2576_s14 = sshll.u32 %s2724_s9, 4  ;;  %s2577_s14 = int_to_ptr.vmem [resolvable:$false] %s2576_s14 }
  0x7b   : > { %p2574_p7 = pnand %p2572_p12, %p3490_p0  ;;  %s2578_s29 = scalar_lea.vmem %s2577_s14, 128 }
  0x7c   : > { %p2579_p4 = scmp.lt.s32.totalorder %s323_s11, %s2577_s14  ;;  %p2580_p8 = scmp.lt.s32.totalorder %s2578_s29, %s2571_s8 }
  0x7d   : > { %p2575_p2 = pneg %p2574_p7 }
  0x7e   : > { %p2581_p10 = por %p2580_p8, %p2579_p4 }
  0x80   : > { %p2582_p11 = pnand %p2581_p10, %p2575_p2 }
  0x82   : > { %2585 = shalt.err (!%p2582_p11)
}
  0x83   : > { %2151 = dma.hbm_to_vmem [thread:$0]  (!%p2936_p6), %s2943_s23, 64, %s323_s11, %s2945_s18  }
  0x84   : > { %p3491_p1 = scmp.ne.s32.totalorder %s3470_s13, 0 }
  0x85   : > { %s3492_s1 = sld [smem:[#allocation24_spill]] (!%p3491_p1)  ;;  %s2984_s24 = sand.u32 (!%p3491_p1), 1, %s2690_s27  }
  0x86   : > { %331 = sbr.rel (%p3491_p1) target bundleno = 535 (0x217), region = 44  ;;  %s1969_s3 = sshll.u32 (!%p3491_p1), %s2984_s24, 6 }
  0x87   : > { %s334_s21 = scalar_lea.sflag (!%p3491_p1), [#allocation4], %s2984_s24  ;;  %s2990_s26 = scalar_lea.vmem (!%p3491_p1), [#allocation3], %s1969_s3 }
  0x8b   : > { %p3493_p3 = scmp.ne.s32.totalorder %s3492_s1, 0 }
  0x8d   : > { %2657 = dma.done.wait (%p3493_p3), %s334_s21, 1024  }
  0x8e   : > { %2659 = vsyncadd (%p3493_p3), %s334_s21, 4294966272  ;;  %s3494_s11 = sld [smem:[#allocation23_spill]] }
  0x8f   : > { %s3495_s13 = sld [smem:[#allocation17_spill]] }
  0x90   : > { %s3496_s15 = sld [smem:[#allocation29_spill]] }
  0x94   : > { %s342_s23 = sand.u32 1, %s3494_s11  }
  0x95   : > { %s344_s18 = sand.u32 1, %s3495_s13   ;;  %s343_s19 = scalar_lea.sflag [#allocation7], %s342_s23 }
  0x96   : > { %s2998_s5 = sshll.u32 %s344_s18, 2  ;;  %p3497_p6 = scmp.ne.s32.totalorder %s3496_s15, 0 }
  0x97   : > { %s346_s12 = scalar_lea.vmem [#allocation6], %s2998_s5 }
  0x98   : > { %2661 = dma.done.wait (%p3497_p6), %s343_s19, 128  }
  0x99   : > { %2663 = vsyncadd (%p3497_p6), %s343_s19, 4294967168  ;;  %s355_s22 = scalar_lea.vmem [#allocation8], %s2998_s5  ;;  %p3498_p9 = scmp.eq.s32.totalorder %s3494_s11, 0 }
  0x9b   : > { %2665 = dma.done.wait (%p3498_p9), [#allocation10], 16896   ;;  %p3499_p5 = pmov %p3498_p9 }
  0x9c   : > { %v2258_v0 = vld [vmem:[#allocation11 + $0xe4] ss:$16 sps:$4 sm:$0xff]   ;;  %v2262_v2 = vld [vmem:[#allocation11 + $0xe0] ss:$16 sps:$4 sm:$0xff]   ;;  %s3500_s16 = sld [smem:[#allocation20_spill]]  ;;  %v439_v33 = vlaneseq  ;;  %v3045_v60 = vld [vmem:[%s2990_s26 + $0x8] sm:$0xff] }
  0x9d   : > { %2667 = vsyncadd (%p3499_p5), [#allocation10], 4294950400  ;;  %v2260_v1 = vld [vmem:[#allocation11 + $0x2e4] ss:$16 sps:$4 sm:$0xff]   ;;  %1599 = vmatprep.subr.bf16.mxu0 %v2258_v0  ;;  %v2263_v3 = vld [vmem:[#allocation11 + $0x2e0] ss:$16 sps:$4 sm:$0xff]  }
  0x9e   : > { %1642 = vmatprep.subr.bf16.mxu1 %v2260_v1  ;;  %v2264_v4 = vld [vmem:[#allocation11 + $0xc4] ss:$16 sps:$4 sm:$0xff]   ;;  %1600 = vmatpush1.bf16.msra.mxu0 %v2262_v2  ;;  %v2268_v6 = vld [vmem:[#allocation11 + $0xc0] ss:$16 sps:$4 sm:$0xff]   ;;  %v3012_v38 = vshrl.u32 %v439_v33, 7  ;;  %s3021_s2 = sld [smem:[#allocation2]] }
  0x9f   : > { %1643 = vmatpush1.bf16.msra.mxu1 %v2263_v3  ;;  %v2266_v5 = vld [vmem:[#allocation11 + $0x2c4] ss:$16 sps:$4 sm:$0xff]   ;;  %1601 = vmatprep.subr.bf16.mxu0 %v2264_v4  ;;  %v2269_v7 = vld [vmem:[#allocation11 + $0x2c0] ss:$16 sps:$4 sm:$0xff]   ;;  %s3505_s25 = sld [smem:[#allocation21_spill]]  ;;  %s3337_s8 = scalar_lea.vmem [#allocation12], %s1969_s3 }
  0xa0   : > { %1644 = vmatprep.subr.bf16.mxu1 %v2266_v5  ;;  %v2270_v8 = vld [vmem:[#allocation11 + $0xa4] ss:$16 sps:$4 sm:$0xff]   ;;  %v2274_v10 = vld [vmem:[#allocation11 + $0xa0] ss:$16 sps:$4 sm:$0xff]   ;;  %v3015_v40 = vadd.s32 8, %v3012_v38  ;;  %v3030_v51 = vsub.s32 1, %v3012_v38 }
  0xa1   : > { %v2272_v9 = vld [vmem:[#allocation11 + $0x2a4] ss:$16 sps:$4 sm:$0xff]   ;;  %v2275_v11 = vld [vmem:[#allocation11 + $0x2a0] ss:$16 sps:$4 sm:$0xff]   ;;  %v3035_v54 = vsub.s32 3, %v3012_v38  ;;  %v3039_v56 = vsub.s32 0, %v3012_v38 }
  0xa2   : > { %1602 = vmatpush1.bf16.msra.mxu0 %v2268_v6  ;;  %v2276_v12 = vld [vmem:[#allocation11 + $0x84] ss:$16 sps:$4 sm:$0xff]   ;;  %v2280_v14 = vld [vmem:[#allocation11 + $0x80] ss:$16 sps:$4 sm:$0xff]   ;;  %s1975_s10 = sshll.u32 %s3500_s16, 4  ;;  %p517_p13 = scmp.gt.s32.totalorder %s3500_s16, 0 }
  0xa3   : > { %1645 = vmatpush1.bf16.msra.mxu1 %v2269_v7  ;;  %1603 = vmatprep.subr.bf16.mxu0 %v2270_v8  ;;  %v2278_v13 = vld [vmem:[#allocation11 + $0x284] ss:$16 sps:$4 sm:$0xff]   ;;  %v2281_v15 = vld [vmem:[#allocation11 + $0x280] ss:$16 sps:$4 sm:$0xff]   ;;  %s2115_s6 = sadd.s32 16, %s1975_s10  ;;  %v500_v41 = vstv %s1975_s10  ;;  %v3042_v57 = vsub.s32 2, %v3012_v38 }
  0xa4   : > { %1646 = vmatprep.subr.bf16.mxu1 %v2272_v9  ;;  %v2282_v16 = vld [vmem:[#allocation11 + $0x64] ss:$16 sps:$4 sm:$0xff]   ;;  %v2286_v18 = vld [vmem:[#allocation11 + $0x60] ss:$16 sps:$4 sm:$0xff]   ;;  %p528_p12 = scmp.lt.s32.totalorder %s2115_s6, 40  ;;  %v3024_v46 = vadd.s32 %v500_v41, %v3012_v38  ;;  %v3027_v47 = vadd.s32 %v500_v41, %v3015_v40  ;;  %vm545_vm4 = vcmp.lt.s32.totalorder %v3012_v38, 1 }
  0xa5   : > { %v2284_v17 = vld [vmem:[#allocation11 + $0x264] ss:$16 sps:$4 sm:$0xff]   ;;  %v2287_v19 = vld [vmem:[#allocation11 + $0x260] ss:$16 sps:$4 sm:$0xff]   ;;  %s3017_s17 = scalar_select %p517_p13, 1, 0 }
  0xa6   : > { %1604 = vmatpush1.bf16.msra.mxu0 %v2274_v10  ;;  %v2288_v20 = vld [vmem:[#allocation11 + $0x44] ss:$16 sps:$4 sm:$0xff]   ;;  %v2292_v22 = vld [vmem:[#allocation11 + $0x40] ss:$16 sps:$4 sm:$0xff]   ;;  %s3019_s20 = scalar_select %p528_p12, 1, 0 }
  0xa7   : > { %1647 = vmatpush1.bf16.msra.mxu1 %v2275_v11  ;;  %1605 = vmatprep.subr.bf16.mxu0 %v2276_v12  ;;  %v2290_v21 = vld [vmem:[#allocation11 + $0x244] ss:$16 sps:$4 sm:$0xff]   ;;  %v2293_v23 = vld [vmem:[#allocation11 + $0x240] ss:$16 sps:$4 sm:$0xff]   ;;  %v523_v52 = vstv %s3017_s17  ;;  %vm503_vm0 = vcmp.lt.s32.totalorder %v3024_v46, 40  ;;  %vm504_vm1 = vcmp.lt.s32.totalorder %v3027_v47, 40  ;;  %v3085_v12 = vstv %s3021_s2 }
  0xa8   : > { %1648 = vmatprep.subr.bf16.mxu1 %v2278_v13  ;;  %v2294_v24 = vld [vmem:[#allocation11 + $0x24] ss:$16 sps:$4 sm:$0xff]   ;;  %v2298_v26 = vld [vmem:[#allocation11 + $0x20] ss:$16 sps:$4 sm:$0xff]   ;;  %v534_v53 = vstv %s3019_s20  ;;  %vm3052_vm2 = vcmp.eq.s32.totalorder %v523_v52, 1  ;;  %vm597_vm5 = vcmp.lt.s32.totalorder %v3012_v38, 7 }
  0xa9   : > { %v2296_v25 = vld [vmem:[#allocation11 + $0x224] ss:$16 sps:$4 sm:$0xff]   ;;  %v2299_v27 = vld [vmem:[#allocation11 + $0x220] ss:$16 sps:$4 sm:$0xff]   ;;  %vm3056_vm3 = vcmp.eq.s32.totalorder %v534_v53, 1  ;;  %vm554_vm6 = vcmp.eq.s32.totalorder %v3012_v38, 0 }
  0xaa   : > { %1606 = vmatpush1.bf16.msra.mxu0 %v2280_v14  ;;  %v2300_v28 = vld [vmem:[#allocation11 + $0x4] ss:$16 sps:$4 sm:$0xff]   ;;  %v2304_v30 = vld [vmem:[#allocation11] ss:$16 sps:$4 sm:$0xff]   ;;  %vm607_vm7 = vcmp.eq.s32.totalorder %v3015_v40, 15  ;;  %s2118_s9 = smul.u32 24, %s3505_s25 }
  0xab   : > { %1649 = vmatpush1.bf16.msra.mxu1 %v2281_v15  ;;  %1607 = vmatprep.subr.bf16.mxu0 %v2282_v16  ;;  %v2302_v29 = vld [vmem:[#allocation11 + $0x204] ss:$16 sps:$4 sm:$0xff]   ;;  %v2305_v31 = vld [vmem:[#allocation11 + $0x200] ss:$16 sps:$4 sm:$0xff]   ;;  %v2368_v38 = vld [vmem:[#allocation11 + $0xac] ss:$16 sps:$4 sm:$0xff]  }
  0xac   : > { %1650 = vmatprep.subr.bf16.mxu1 %v2284_v17  ;;  %v2306_v32 = vld [vmem:[#allocation11 + $0x1e4] ss:$16 sps:$4 sm:$0xff]   ;;  %v2310_v35 = vld [vmem:[#allocation11 + $0x1e0] ss:$16 sps:$4 sm:$0xff]   ;;  %v3094_v17 = vld [vmem:[%s2990_s26 + $0x28] sm:$0xff]  ;;  %s2116_s14 = sshll.u32 %s3500_s16, 3 }
  0xad   : > { %v2308_v34 = vld [vmem:[#allocation11 + $0x3e4] ss:$16 sps:$4 sm:$0xff]   ;;  %v2311_v36 = vld [vmem:[#allocation11 + $0x3e0] ss:$16 sps:$4 sm:$0xff]   ;;  %s1793_s29 = sadd.s32 %s2118_s9, %s2116_s14  ;;  %s1796_s1 = sshll.u32 %s3337_s8, 4  ;;  %s3352_s1 = int_to_ptr.vmem [resolvable:$true] %s1796_s1 }
  0xae   : > { %1608 = vmatpush1.bf16.msra.mxu0 %v2286_v18  ;;  %v2312_v37 = vld [vmem:[#allocation11 + $0x1c4] ss:$16 sps:$4 sm:$0xff]   ;;  %v2316_v42 = vld [vmem:[#allocation11 + $0x1c0] ss:$16 sps:$4 sm:$0xff]   ;;  %v431_v18 = vmax.f32 %v3045_v60, 0.0  ;;  %s3506_s3 = sld [smem:[#allocation30_spill]] }
  0xaf   : > { %1651 = vmatpush1.bf16.msra.mxu1 %v2287_v19  ;;  %1609 = vmatprep.subr.bf16.mxu0 %v2288_v20  ;;  %v2314_v39 = vld [vmem:[#allocation11 + $0x3c4] ss:$16 sps:$4 sm:$0xff]   ;;  %v2317_v43 = vld [vmem:[#allocation11 + $0x3c0] ss:$16 sps:$4 sm:$0xff]   ;;  %s2108_s21 = sshll.u32 %s1793_s29, 7  ;;  %s3507_s13 = sld [smem:[#allocation35_spill]] }
  0xb0   : > { %1652 = vmatprep.subr.bf16.mxu1 %v2290_v21  ;;  %v2318_v44 = vld [vmem:[#allocation11 + $0x1a4] ss:$16 sps:$4 sm:$0xff]   ;;  %v2322_v48 = vld [vmem:[#allocation11 + $0x1a0] ss:$16 sps:$4 sm:$0xff]   ;;  %v3107_v21 = vld [vmem:[%s2990_s26 + $0x18] sm:$0xff]  ;;  %s1780_s23 = scalar_lea.sflag [#allocation5], %s2984_s24 }
  0xb1   : > { %v2320_v45 = vld [vmem:[#allocation11 + $0x3a4] ss:$16 sps:$4 sm:$0xff]   ;;  %v2323_v49 = vld [vmem:[#allocation11 + $0x3a0] ss:$16 sps:$4 sm:$0xff]   ;;  %s2586_s18 = scalar_lea.vmem %s3352_s1, 1024  ;;  %s2725_s5 = smov [#allocation12]  }
  0xb2   : > { %1610 = vmatpush1.bf16.msra.mxu0 %v2292_v22  ;;  %v2324_v50 = vld [vmem:[#allocation11 + $0x184] ss:$16 sps:$4 sm:$0xff]   ;;  %v2328_v58 = vld [vmem:[#allocation11 + $0x180] ss:$16 sps:$4 sm:$0xff]   ;;  %p2587_p0 = scmp.ne.s32.totalorder %s3352_s1, %s2586_s18  ;;  %s2590_s19 = sshll.u32 %s2725_s5, 4  ;;  %s2591_s19 = int_to_ptr.vmem [resolvable:$false] %s2590_s19 }
  0xb3   : > { %1653 = vmatpush1.bf16.msra.mxu1 %v2293_v23  ;;  %1611 = vmatprep.subr.bf16.mxu0 %v2294_v24  ;;  %v2326_v55 = vld [vmem:[#allocation11 + $0x384] ss:$16 sps:$4 sm:$0xff]   ;;  %v2329_v59 = vld [vmem:[#allocation11 + $0x380] ss:$16 sps:$4 sm:$0xff]   ;;  %v435_v24 = vmax.f32 %v3094_v17, 0.0  ;;  %p2593_p8 = scmp.lt.s32.totalorder %s3352_s1, %s2591_s19 }
  0xb4   : > { %1654 = vmatprep.subr.bf16.mxu1 %v2296_v25  ;;  %v2330_v61 = vld [vmem:[#allocation11 + $0x164] ss:$16 sps:$4 sm:$0xff]   ;;  %v3048_v63 = vld [vmem:[#allocation9] ss:$8 sm:$0xf]  ;;  %p3508_p7 = scmp.ne.s32.totalorder %s3506_s3, 0 }
  0xb5   : > { %v2332_v62 = vld [vmem:[#allocation11 + $0x364] ss:$16 sps:$4 sm:$0xff]   ;;  %v3050_v0 = vld [vmem:[#allocation9 + $0x1] ss:$8 sm:$0xf]  ;;  %v446_v5 = vrot.slane %v3048_v63, %v3030_v51  ;;  %v454_v7 = vrot.slane %v3048_v63, %v3035_v54  ;;  %s3359_s15 = scalar_lea.hbm %s3507_s13, %s2108_s21 }
  0xb6   : > { %1612 = vmatpush1.bf16.msra.mxu0 %v2298_v26  ;;  %v3060_v3 = vld [vmem:[#allocation9 + $0x2] ss:$8 sm:$0xf]  ;;  %v3062_v4 = vld [vmem:[#allocation9 + $0x3] ss:$8 sm:$0xf]  ;;  %v475_v6 = vrot.slane %v3050_v0, %v3030_v51  ;;  %v3089_v13 = vrot.slane %v3050_v0, %v3035_v54  ;;  %p2588_p2 = pnand %p2587_p0, %p3508_p7 }
  0xb7   : > { %1655 = vmatpush1.bf16.msra.mxu1 %v2299_v27  ;;  %1613 = vmatprep.subr.bf16.mxu0 %v2300_v28  ;;  %v3070_v8 = vld [vmem:[#allocation9 + $0x4] ss:$8 sm:$0xf]  ;;  %v3072_v9 = vld [vmem:[#allocation9 + $0x5] ss:$8 sm:$0xf]  ;;  %v3078_v10 = vrot.slane %v3060_v3, %v3030_v51  ;;  %v3082_v11 = vrot.slane %v3062_v4, %v3030_v51  ;;  %v3111_v22 = vrot.slane %v3060_v3, %v3035_v54 }
  0xb8   : > { %1656 = vmatprep.subr.bf16.mxu1 %v2302_v29  ;;  %v2334_v14 = vld [vmem:[#allocation11 + $0x160] ss:$16 sps:$4 sm:$0xff]   ;;  %v3091_v16 = vld [vmem:[#allocation9 + $0x6] ss:$8 sm:$0xf]  ;;  %v3100_v19 = vrot.slane %v3070_v8, %v3030_v51  ;;  %v3104_v20 = vrot.slane %v3072_v9, %v3030_v51  ;;  %v3128_v29 = vrot.slane %v3062_v4, %v3035_v54  ;;  %v781_v40 = vrot.slane %v3072_v9, %v3042_v57  ;;  %p2589_p4 = pneg %p2588_p2 }
  0xb9   : > { %v2335_v15 = vld [vmem:[#allocation11 + $0x360] ss:$16 sps:$4 sm:$0xff]   ;;  %v2336_v23 = vld [vmem:[#allocation11 + $0x144] ss:$16 sps:$4 sm:$0xff]   ;;  %v529_v26 = vld [vmem:[%s355_s22] sm:$0xf]  ;;  %v3121_v27 = vrot.slane %v3091_v16, %v3030_v51 }
  0xba   : > { %1614 = vmatpush1.bf16.msra.mxu0 %v2304_v30  ;;  %v518_v25 = vld [vmem:[%s346_s12] sm:$0xf]  ;;  %v3124_v28 = vld [vmem:[%s2990_s26 + $0x38] sm:$0xff]  ;;  %v3132_v30 = vrot.slane %v3070_v8, %v3035_v54  ;;  %v530_v33 = vmax.f32 %v529_v26, 0.0  ;;  %s2592_s12 = scalar_lea.vmem %s2591_s19, 2048 }
  0xbb   : > { %1657 = vmatpush1.bf16.msra.mxu1 %v2305_v31  ;;  %1615 = vmatprep.subr.bf16.mxu0 %v2306_v32  ;;  %v460_v31 = vmul.f32 %v446_v5, %v431_v18  ;;  %v519_v32 = vmax.f32 %v518_v25, 0.0  ;;  %v437_v41 = vmax.f32 %v3124_v28, 0.0  ;;  %v2346_v1 = vld [vmem:[#allocation11 + $0x120] ss:$16 sps:$4 sm:$0xff]   ;;  %p2594_p10 = scmp.lt.s32.totalorder %s2592_s12, %s2586_s18 }
  0xbc   : > { %1658 = vmatprep.subr.bf16.mxu1 %v2308_v34  ;;  %v433_v34 = vmax.f32 %v3107_v21, 0.0 }
  0xbd   : > { %v466_v53 = vmul.f32 %v454_v7, %v437_v41  ;;  %v2347_v41 = vld [vmem:[#allocation11 + $0x320] ss:$16 sps:$4 sm:$0xff]   ;;  %p2595_p11 = por %p2594_p10, %p2593_p8 }
  0xbe   : > { %1616 = vmatpush2.bf16.msra.mxu0 %v2310_v35  ;;  %v3136_v35 = vld [vmem:[%s2990_s26] sm:$0xff] }
  0xbf   : > { %1659 = vmatpush2.bf16.msra.mxu1 %v2311_v36  ;;  %1617 = vmatprep.subr.bf16.mxu0 %v2312_v37  ;;  %v3139_v36 = vld [vmem:[%s2990_s26 + $0x20] sm:$0xff]  ;;  %p2596_p1 = pnand %p2595_p11, %p2589_p4 }
  0xc0   : > { %1660 = vmatprep.subr.bf16.mxu1 %v2314_v39  ;;  %v2338_v37 = vld [vmem:[#allocation11 + $0x344] ss:$16 sps:$4 sm:$0xff]   ;;  %v464_v39 = vmul.f32 %v446_v5, %v435_v24 }
  0xc2   : > { %1618 = vmatpush2.bf16.msra.mxu0 %v2316_v42  ;;  %v3144_v42 = vrot.slane %v3072_v9, %v3035_v54  ;;  %v493_v52 = vadd.f32 %v475_v6, %v464_v39  ;;  %v495_v39 = vadd.f32 %v3089_v13, %v466_v53 }
  0xc3   : > { %1661 = vmatpush2.bf16.msra.mxu1 %v2317_v43  ;;  %1619 = vmatprep.subr.bf16.mxu0 %v2318_v44  ;;  %v3148_v43 = vrot.slane %v3091_v16, %v3035_v54  ;;  %v489_v44 = vadd.f32 %v475_v6, %v460_v31  ;;  %v2344_v6 = vld [vmem:[#allocation11 + $0x324] ss:$16 sps:$4 sm:$0xff]  }
  0xc4   : > { %1662 = vmatprep.subr.bf16.mxu1 %v2320_v45  ;;  %v520_v45 = vmul.f32 %v519_v32, %v3048_v63 }
  0xc6   : > { %1620 = vmatpush2.bf16.msra.mxu0 %v2322_v48  ;;  %v531_v48 = vmul.f32 %v530_v33, %v3048_v63  ;;  %v521_v5 = vadd.f32 %v520_v45, %v3050_v0 }
  0xc7   : > { %1663 = vmatpush2.bf16.msra.mxu1 %v2323_v49  ;;  %1621 = vmatprep.subr.bf16.mxu0 %v2324_v50  ;;  %v462_v49 = vmul.f32 %v454_v7, %v433_v34  ;;  %v2340_v50 = vld [vmem:[#allocation11 + $0x140] ss:$16 sps:$4 sm:$0xff]   ;;  %v514_v7 = vsel %vm504_vm1, %v493_v52, 0.0  ;;  %v516_v52 = vsel %vm504_vm1, %v495_v39, 0.0 }
  0xc8   : > { %1664 = vmatprep.subr.bf16.mxu1 %v2326_v55  ;;  %v430_v55 = vmax.f32 %v3136_v35, 0.0  ;;  %v532_v18 = vadd.f32 %v531_v48, %v3050_v0  ;;  %v3164_v26 = vsel %vm3052_vm2, %v521_v5, 0.0  ;;  %v542_v32 = vrot.slane %v514_v7, 7  ;;  %v3196_v5 = vld [vmem:[%s2990_s26 + $0x10] sm:$0xff] }
  0xc9   : > { %v491_v24 = vadd.f32 %v3089_v13, %v462_v49  ;;  %v594_v33 = vrot.slane %v514_v7, 1  ;;  %v2350_v13 = vld [vmem:[#allocation11 + $0x304] ss:$16 sps:$4 sm:$0xff]   ;;  %v432_v39 = vmax.f32 %v3196_v5, 0.0 }
  0xca   : > { %1622 = vmatpush2.bf16.msra.mxu0 %v2328_v58  ;;  %v434_v58 = vmax.f32 %v3139_v36, 0.0  ;;  %v3168_v31 = vsel %vm3056_vm3, %v532_v18, 0.0 }
  0xcb   : > { %1665 = vmatpush2.bf16.msra.mxu1 %v2329_v59  ;;  %1623 = vmatprep.subr.bf16.mxu0 %v2330_v61  ;;  %v2341_v59 = vld [vmem:[#allocation11 + $0x340] ss:$16 sps:$4 sm:$0xff]   ;;  %v2342_v61 = vld [vmem:[#allocation11 + $0x124] ss:$16 sps:$4 sm:$0xff]   ;;  %v620_v34 = vrot.slane %v3168_v31, %v3030_v51 }
  0xcc   : > { %1666 = vmatprep.subr.bf16.mxu1 %v2332_v62  ;;  %v510_v62 = vsel %vm503_vm0, %v489_v44, 0.0 }
  0xcd   : > { %v538_v25 = vrot.slane %v510_v62, 7 }
  0xce   : > { %1624 = vmatpush2.bf16.msra.mxu0 %v2334_v14  ;;  %v590_v14 = vrot.slane %v510_v62, 1 }
  0xcf   : > { %1667 = vmatpush2.bf16.msra.mxu1 %v2335_v15  ;;  %1625 = vmatprep.subr.bf16.mxu0 %v2336_v23  ;;  %v692_v15 = vmul.f32 %v3082_v11, %v510_v62  ;;  %v568_v23 = vrot.slane %v3164_v26, %v3030_v51  ;;  %v547_v2 = vsel %vm545_vm4, %v538_v25, %v542_v32  ;;  %v512_v51 = vsel %vm503_vm0, %v491_v24, 0.0 }
  0xd0   : > { %1668 = vmatprep.subr.bf16.mxu1 %v2338_v37  ;;  %v696_v37 = vmul.f32 %v3082_v11, %v514_v7  ;;  %v551_v44 = vsel %vm545_vm4, %v542_v32, %v538_v25  ;;  %v599_v45 = vsel %vm597_vm5, %v590_v14, %v594_v33  ;;  %v2348_v11 = vld [vmem:[#allocation11 + $0x104] ss:$16 sps:$4 sm:$0xff]   ;;  %v603_v49 = vsel %vm597_vm5, %v594_v33, %v590_v14  ;;  %v2352_v25 = vld [vmem:[#allocation11 + $0x100] ss:$16 sps:$4 sm:$0xff]  }
  0xd1   : > { %v582_v48 = vsel %vm554_vm6, %v568_v23, %v551_v44  ;;  %v638_v53 = vsel %vm607_vm7, %v620_v34, %v603_v49  ;;  %v540_v62 = vrot.slane %v512_v51, 7  ;;  %v576_v7 = vrot.slane %v3164_v26, %v3035_v54  ;;  %v2353_v14 = vld [vmem:[#allocation11 + $0x300] ss:$16 sps:$4 sm:$0xff]   ;;  %v2359_v44 = vld [vmem:[#allocation11 + $0x2ec] ss:$16 sps:$4 sm:$0xff]  }
  0xd2   : > { %1626 = vmatpush2.bf16.msra.mxu0 %v2340_v50  ;;  %v667_v50 = vmul.f32 %v3078_v10, %v547_v2  ;;  %v733_v24 = vmul.f32 %v3100_v19, %v638_v53  ;;  %v592_v33 = vrot.slane %v512_v51, 1  ;;  %v596_v23 = vrot.slane %v516_v52, 1 }
  0xd3   : > { %1669 = vmatpush2.bf16.msra.mxu1 %v2341_v59  ;;  %1627 = vmatprep.subr.bf16.mxu0 %v2342_v61  ;;  %v663_v59 = vmul.f32 %v3078_v10, %v582_v48  ;;  %v729_v61 = vmul.f32 %v3100_v19, %v599_v45  ;;  %v628_v10 = vrot.slane %v3168_v31, %v3035_v54 }
  0xd4   : > { %1670 = vmatprep.subr.bf16.mxu1 %v2344_v6  ;;  %v704_v18 = vadd.f32 %v696_v37, %v667_v50  ;;  %v544_v6 = vrot.slane %v516_v52, 7  ;;  %v601_v2 = vsel %vm597_vm5, %v592_v33, %v596_v23  ;;  %v605_v54 = vsel %vm597_vm5, %v596_v23, %v592_v33 }
  0xd5   : > { %v700_v32 = vadd.f32 %v692_v15, %v663_v59  ;;  %v694_v50 = vmul.f32 %v3128_v29, %v512_v51  ;;  %v698_v59 = vmul.f32 %v3128_v29, %v516_v52  ;;  %v471_v51 = vrot.slane %v3050_v0, %v3039_v56 }
  0xd6   : > { %1628 = vmatpush2.bf16.msra.mxu0 %v2346_v1  ;;  %v741_v34 = vadd.f32 %v733_v24, %v704_v18  ;;  %v549_v19 = vsel %vm545_vm4, %v540_v62, %v544_v6  ;;  %v553_v37 = vsel %vm545_vm4, %v544_v6, %v540_v62  ;;  %v2356_v1 = vld [vmem:[#allocation11 + $0xec] ss:$16 sps:$4 sm:$0xff]   ;;  %v564_v29 = vrot.slane %v3164_v26, %v3039_v56 }
  0xd7   : > { %1671 = vmatpush2.bf16.msra.mxu1 %v2347_v41  ;;  %1629 = vmatprep.subr.bf16.mxu0 %v2348_v11  ;;  %v737_v41 = vadd.f32 %v729_v61, %v700_v32  ;;  %v584_v15 = vsel %vm554_vm6, %v576_v7, %v553_v37  ;;  %v640_v11 = vsel %vm607_vm7, %v628_v10, %v605_v54 }
  0xd8   : > { %1672 = vmatprep.subr.bf16.mxu1 %v2350_v13  ;;  %vm749_vm8 = vcmp.gt.f32.partialorder %v741_v34, 0.0  ;;  %v758_v45 = vmul.f32 %v3085_v12, %v741_v34  ;;  %v665_v13 = vmul.f32 %v3111_v22, %v584_v15  ;;  %v669_v49 = vmul.f32 %v3111_v22, %v549_v19 }
  0xd9   : > { %vm745_vm9 = vcmp.gt.f32.partialorder %v737_v41, 0.0  ;;  %v754_v48 = vmul.f32 %v3085_v12, %v737_v41  ;;  %v731_v61 = vmul.f32 %v3132_v30, %v601_v2  ;;  %v735_v62 = vmul.f32 %v3132_v30, %v640_v11 }
  0xda   : > { %1630 = vmatpush2.bf16.msra.mxu0 %v2352_v25  ;;  %v766_v53 = vsel %vm749_vm8, %v741_v34, %v758_v45  ;;  %v702_v6 = vadd.f32 %v694_v50, %v665_v13  ;;  %v442_v7 = vrot.slane %v3048_v63, %v3039_v56  ;;  %v706_v25 = vadd.f32 %v698_v59, %v669_v49 }
  0xdb   : > { %1673 = vmatpush2.bf16.msra.mxu1 %v2353_v14  ;;  %1685 = vmatprep.subr.bf16.mxu0 %v2356_v1  ;;  %v762_v18 = vsel %vm745_vm9, %v737_v41, %v754_v48  ;;  %v795_v24 = vmul.f32 %v3104_v20, %v766_v53  ;;  %v645_v10 = vrot.slane %v3060_v3, %v3039_v56 }
  0xdc   : > { %1728 = vmatprep.subr.bf16.mxu1 %v2359_v44  ;;  %v791_v22 = vmul.f32 %v3104_v20, %v762_v18  ;;  %v739_v52 = vadd.f32 %v731_v61, %v702_v6  ;;  %v459_v14 = vmul.f32 %v442_v7, %v430_v55  ;;  %v463_v32 = vmul.f32 %v442_v7, %v434_v58  ;;  %v3270_v7 = vld [vmem:[%s2990_s26 + $0x30] sm:$0xff] }
  0xdd   : > { %v824_v30 = vadd.f32 %v3121_v27, %v795_v24  ;;  %v743_v23 = vadd.f32 %v735_v62, %v706_v25  ;;  %v616_v20 = vrot.slane %v3168_v31, %v3039_v56  ;;  %v711_v2 = vrot.slane %v3070_v8, %v3039_v56 }
  0xde   : > { %v820_v33 = vadd.f32 %v3121_v27, %v791_v22  ;;  %vm747_vm10 = vcmp.gt.f32.partialorder %v739_v52, 0.0  ;;  %v756_v34 = vmul.f32 %v3085_v12, %v739_v52  ;;  %v488_v19 = vadd.f32 %v471_v51, %v459_v14 }
  0xdf   : > { %v492_v37 = vadd.f32 %v471_v51, %v463_v32  ;;  %vm751_vm11 = vcmp.gt.f32.partialorder %v743_v23, 0.0  ;;  %v760_v55 = vmul.f32 %v3085_v12, %v743_v23  ;;  %v674_v27 = vrot.slane %v3062_v4, %v3039_v56 }
  0xe0   : > { %v3243_v1 = vpack.c.bf16 %v824_v30, %v820_v33  ;;  %v764_v58 = vsel %vm747_vm10, %v739_v52, %v756_v34  ;;  %v509_v41 = vsel %vm503_vm0, %v488_v19, 0.0  ;;  %v450_v33 = vrot.slane %v3048_v63, %v3042_v57 }
  0xe1   : > { %v513_v15 = vsel %vm504_vm1, %v492_v37, 0.0  ;;  %v768_v54 = vsel %vm751_vm11, %v743_v23, %v760_v55  ;;  %v793_v44 = vmul.f32 %v3144_v42, %v764_v58  ;;  %v537_v45 = vrot.slane %v509_v41, 7 }
  0xe2   : > { %1631 = vmatprep.mubr.bf16.mxu0 %v3243_v1  ;;  %v541_v11 = vrot.slane %v513_v15, 7  ;;  %v797_v13 = vmul.f32 %v3144_v42, %v768_v54  ;;  %v589_v48 = vrot.slane %v509_v41, 1  ;;  %v593_v49 = vrot.slane %v513_v15, 1 }
  0xe3   : > { %v691_v50 = vmul.f32 %v674_v27, %v509_v41  ;;  %v822_v53 = vadd.f32 %v3148_v43, %v793_v44  ;;  %v695_v62 = vmul.f32 %v674_v27, %v513_v15  ;;  %v479_v23 = vrot.slane %v3050_v0, %v3042_v57 }
  0xe4   : > { %v546_v59 = vsel %vm545_vm4, %v537_v45, %v541_v11  ;;  %v550_v61 = vsel %vm545_vm4, %v541_v11, %v537_v45  ;;  %v826_v18 = vadd.f32 %v3148_v43, %v797_v13  ;;  %v598_v42 = vsel %vm597_vm5, %v589_v48, %v593_v49 }
  0xe5   : > { %v581_v24 = vsel %vm554_vm6, %v564_v29, %v550_v61  ;;  %v602_v6 = vsel %vm597_vm5, %v593_v49, %v589_v48  ;;  %v666_v51 = vmul.f32 %v645_v10, %v546_v59  ;;  %v728_v30 = vmul.f32 %v711_v2, %v598_v42 }
  0xe6   : > { %v637_v22 = vsel %vm607_vm7, %v616_v20, %v602_v6  ;;  %v662_v25 = vmul.f32 %v645_v10, %v581_v24  ;;  %v3274_v52 = vpack.c.bf16 %v826_v18, %v822_v53  ;;  %v436_v29 = vmax.f32 %v3270_v7, 0.0 }
  0xe7   : > { %v732_v43 = vmul.f32 %v711_v2, %v637_v22  ;;  %v703_v32 = vadd.f32 %v695_v62, %v666_v51  ;;  %v461_v10 = vmul.f32 %v450_v33, %v432_v39  ;;  %v773_v37 = vrot.slane %v3072_v9, %v3039_v56  ;;  %v2354_v62 = vld [vmem:[#allocation11 + $0xe8] ss:$16 sps:$4 sm:$0xff]   ;;  %v2362_v22 = vld [vmem:[#allocation11 + $0xcc] ss:$16 sps:$4 sm:$0xff]  }
  0xe8   : > { %v699_v14 = vadd.f32 %v691_v50, %v662_v25  ;;  %1674 = vmatprep.mubr.bf16.mxu1 %v3274_v52  ;;  %v465_v19 = vmul.f32 %v450_v33, %v436_v29  ;;  %v802_v55 = vrot.slane %v3091_v16, %v3039_v56  ;;  %v572_v63 = vrot.slane %v3164_v26, %v3042_v57  ;;  %v2372_v9 = vld [vmem:[#allocation11 + $0x88] ss:$16 sps:$4 sm:$0xff]  }
  0xe9   : > { %v740_v20 = vadd.f32 %v732_v43, %v703_v32  ;;  %v490_v58 = vadd.f32 %v479_v23, %v461_v10  ;;  %v624_v39 = vrot.slane %v3168_v31, %v3042_v57  ;;  %v682_v15 = vrot.slane %v3062_v4, %v3042_v57  ;;  %v2360_v32 = vld [vmem:[#allocation11 + $0xc8] ss:$16 sps:$4 sm:$0xff]  }
  0xea   : > { %v736_v34 = vadd.f32 %v728_v30, %v699_v14  ;;  %v494_v41 = vadd.f32 %v479_v23, %v465_v19  ;;  %v653_v56 = vrot.slane %v3060_v3, %v3042_v57  ;;  %v719_v26 = vrot.slane %v3070_v8, %v3042_v57  ;;  %v2366_v10 = vld [vmem:[#allocation11 + $0xa8] ss:$16 sps:$4 sm:$0xff]  }
  0xeb   : > { %vm748_vm13 = vcmp.gt.f32.partialorder %v740_v20, 0.0  ;;  %v757_v0 = vmul.f32 %v3085_v12, %v740_v20  ;;  %v511_v11 = vsel %vm503_vm0, %v490_v58, 0.0  ;;  %v2380_v58 = vld [vmem:[#allocation11 + $0x6c] ss:$16 sps:$4 sm:$0xff]  }
  0xec   : > { %vm744_vm12 = vcmp.gt.f32.partialorder %v736_v34, 0.0  ;;  %v753_v27 = vmul.f32 %v3085_v12, %v736_v34  ;;  %v515_v13 = vsel %vm504_vm1, %v494_v41, 0.0  ;;  %v539_v31 = vrot.slane %v511_v11, 7  ;;  %v2357_v41 = vld [vmem:[#allocation11 + $0x2e8] ss:$16 sps:$4 sm:$0xff]  }
  0xed   : > { %v765_v54 = vsel %vm748_vm13, %v740_v20, %v757_v0  ;;  %v543_v48 = vrot.slane %v515_v13, 7  ;;  %v591_v49 = vrot.slane %v511_v11, 1  ;;  %v595_v4 = vrot.slane %v515_v13, 1 }
  0xee   : > { %v761_v2 = vsel %vm744_vm12, %v736_v34, %v753_v27  ;;  %v794_v45 = vmul.f32 %v773_v37, %v765_v54  ;;  %v693_v59 = vmul.f32 %v682_v15, %v511_v11  ;;  %v697_v61 = vmul.f32 %v682_v15, %v515_v13  ;;  %v2363_v15 = vld [vmem:[#allocation11 + $0x2c8] ss:$16 sps:$4 sm:$0xff]   ;;  %v2398_v11 = vld [vmem:[#allocation11 + $0xc] ss:$16 sps:$4 sm:$0xff]  }
  0xef   : > { %v790_v44 = vmul.f32 %v773_v37, %v761_v2  ;;  %v548_v3 = vsel %vm545_vm4, %v539_v31, %v543_v48  ;;  %v552_v8 = vsel %vm545_vm4, %v543_v48, %v539_v31  ;;  %v600_v46 = vsel %vm597_vm5, %v591_v49, %v595_v4  ;;  %v2371_v2 = vld [vmem:[#allocation11 + $0x2ac] ss:$16 sps:$4 sm:$0xff]   ;;  %v2384_v54 = vld [vmem:[#allocation11 + $0x48] ss:$16 sps:$4 sm:$0xff]  }
  0xf0   : > { %v823_v53 = vadd.f32 %v802_v55, %v794_v45  ;;  %v604_v47 = vsel %vm597_vm5, %v595_v4, %v591_v49  ;;  %v583_v24 = vsel %vm554_vm6, %v572_v63, %v552_v8  ;;  %v668_v6 = vmul.f32 %v653_v56, %v548_v3  ;;  %v2390_v45 = vld [vmem:[#allocation11 + $0x28] ss:$16 sps:$4 sm:$0xff]   ;;  %v2383_v31 = vld [vmem:[#allocation11 + $0x26c] ss:$16 sps:$4 sm:$0xff]  }
  0xf1   : > { %v819_v50 = vadd.f32 %v802_v55, %v790_v44  ;;  %v639_v42 = vsel %vm607_vm7, %v624_v39, %v604_v47  ;;  %v664_v25 = vmul.f32 %v653_v56, %v583_v24  ;;  %v730_v51 = vmul.f32 %v719_v26, %v600_v46  ;;  %v2392_v56 = vld [vmem:[#allocation11 + $0x2c] ss:$16 sps:$4 sm:$0xff]   ;;  %v2375_v13 = vld [vmem:[#allocation11 + $0x288] ss:$16 sps:$4 sm:$0xff]  }
  0xf2   : > { %v734_v30 = vmul.f32 %v719_v26, %v639_v42  ;;  %v705_v43 = vadd.f32 %v697_v61, %v668_v6  ;;  %v810_v20 = vrot.slane %v3091_v16, %v3042_v57  ;;  %v2378_v57 = vld [vmem:[#allocation11 + $0x68] ss:$16 sps:$4 sm:$0xff]   ;;  %v2386_v16 = vld [vmem:[#allocation11 + $0x4c] ss:$16 sps:$4 sm:$0xff]  }
  0xf3   : > { %v3312_v18 = vpack.c.bf16 %v823_v53, %v819_v50  ;;  %v701_v14 = vadd.f32 %v693_v59, %v664_v25  ;;  %v2369_v26 = vld [vmem:[#allocation11 + $0x2a8] ss:$16 sps:$4 sm:$0xff]   ;;  %v2377_v44 = vld [vmem:[#allocation11 + $0x28c] ss:$16 sps:$4 sm:$0xff]  }
  0xf4   : > { %v742_v29 = vadd.f32 %v734_v30, %v705_v43  ;;  %v2404_v48 = vld [vmem:[#allocation11 + $0x1ec] ss:$16 sps:$4 sm:$0xff]   ;;  %v2381_v49 = vld [vmem:[#allocation11 + $0x268] ss:$16 sps:$4 sm:$0xff]  }
  0xf5   : > { %1632 = vmatmul.mubr.bf16.vlgmr.msra.gmra.mxu0 %v3312_v18  ;;  %v738_v33 = vadd.f32 %v730_v51, %v701_v14  ;;  %v2389_v4 = vld [vmem:[#allocation11 + $0x24c] ss:$16 sps:$4 sm:$0xff]   ;;  %v2402_v50 = vld [vmem:[#allocation11 + $0x1e8] ss:$16 sps:$4 sm:$0xff]  }
  0xf6   : > { %1686 = vmatpush1.bf16.msra.mxu0 %v2354_v62  ;;  %1717 = vmatprep.mubr.bf16.mxu0 %v3243_v1  ;;  %vm750_vm14 = vcmp.gt.f32.partialorder %v742_v29, 0.0  ;;  %v759_v23 = vmul.f32 %v3085_v12, %v742_v29  ;;  %v2374_v1 = vld [vmem:[#allocation11 + $0x8c] ss:$16 sps:$4 sm:$0xff]   ;;  %v2387_v59 = vld [vmem:[#allocation11 + $0x248] ss:$16 sps:$4 sm:$0xff]  }
  0xf7   : > { %1687 = vmatprep.subr.bf16.mxu0 %v2362_v22  ;;  %vm746_vm15 = vcmp.gt.f32.partialorder %v738_v33, 0.0  ;;  %v755_v34 = vmul.f32 %v3085_v12, %v738_v33  ;;  %v2365_v12 = vld [vmem:[#allocation11 + $0x2cc] ss:$16 sps:$4 sm:$0xff]   ;;  %v2408_v3 = vld [vmem:[#allocation11 + $0x1c8] ss:$16 sps:$4 sm:$0xff]  }
  0xf8   : > { %v767_v19 = vsel %vm750_vm14, %v742_v29, %v759_v23  ;;  %v2410_v53 = vld [vmem:[#allocation11 + $0x1cc] ss:$16 sps:$4 sm:$0xff]   ;;  %v2393_v46 = vld [vmem:[#allocation11 + $0x228] ss:$16 sps:$4 sm:$0xff]  }
  0xf9   : > { %v763_v37 = vsel %vm746_vm15, %v738_v33, %v755_v34  ;;  %v796_v55 = vmul.f32 %v781_v40, %v767_v19  ;;  %v2395_v61 = vld [vmem:[#allocation11 + $0x22c] ss:$16 sps:$4 sm:$0xff]   ;;  %v2414_v62 = vld [vmem:[#allocation11 + $0x1a8] ss:$16 sps:$4 sm:$0xff]  }
  0xfa   : > { %1688 = vmatpush1.bf16.msra.mxu0 %v2360_v32  ;;  %v792_v63 = vmul.f32 %v781_v40, %v763_v37  ;;  %v2416_v8 = vld [vmem:[#allocation11 + $0x1ac] ss:$16 sps:$4 sm:$0xff]   ;;  %v2399_v42 = vld [vmem:[#allocation11 + $0x208] ss:$16 sps:$4 sm:$0xff]  }
  0xfb   : > { %1689 = vmatprep.subr.bf16.mxu0 %v2368_v38  ;;  %v825_v27 = vadd.f32 %v810_v20, %v796_v55  ;;  %v2401_v47 = vld [vmem:[#allocation11 + $0x20c] ss:$16 sps:$4 sm:$0xff]   ;;  %v2420_v22 = vld [vmem:[#allocation11 + $0x188] ss:$16 sps:$4 sm:$0xff]  }
  0xfc   : > { %v821_v0 = vadd.f32 %v810_v20, %v792_v63  ;;  %v2422_v24 = vld [vmem:[#allocation11 + $0x18c] ss:$16 sps:$4 sm:$0xff]   ;;  %v2405_v51 = vld [vmem:[#allocation11 + $0x3e8] ss:$16 sps:$4 sm:$0xff]  }
  0xfd   : > { %v2407_v6 = vld [vmem:[#allocation11 + $0x3ec] ss:$16 sps:$4 sm:$0xff]   ;;  %v2426_v43 = vld [vmem:[#allocation11 + $0x168] ss:$16 sps:$4 sm:$0xff]  }
  0xfe   : > { %1690 = vmatpush1.bf16.msra.mxu0 %v2366_v10  ;;  %v3326_v39 = vpack.c.bf16 %v825_v27, %v821_v0  ;;  %v2428_v25 = vld [vmem:[#allocation11 + $0x16c] ss:$16 sps:$4 sm:$0xff]   ;;  %v2411_v32 = vld [vmem:[#allocation11 + $0x3c8] ss:$16 sps:$4 sm:$0xff]  }
  0xff   : > { %1691 = vmatprep.subr.bf16.mxu0 %v2374_v1  ;;  %v2413_v30 = vld [vmem:[#allocation11 + $0x3cc] ss:$16 sps:$4 sm:$0xff]   ;;  %v2432_v38 = vld [vmem:[#allocation11 + $0x148] ss:$16 sps:$4 sm:$0xff]  }
 0x100   : > { %1675 = vmatmul.mubr.bf16.vlgmr.msra.gmra.mxu1 %v3326_v39  ;;  %v2434_v14 = vld [vmem:[#allocation11 + $0x14c] ss:$16 sps:$4 sm:$0xff]   ;;  %v2417_v40 = vld [vmem:[#allocation11 + $0x3a8] ss:$16 sps:$4 sm:$0xff]  }
 0x101   : > { %1729 = vmatpush1.bf16.msra.mxu1 %v2357_v41  ;;  %1760 = vmatprep.mubr.bf16.mxu1 %v3274_v52  ;;  %v2396_v52 = vld [vmem:[#allocation11 + $0x8] ss:$16 sps:$4 sm:$0xff]   ;;  %v2419_v29 = vld [vmem:[#allocation11 + $0x3ac] ss:$16 sps:$4 sm:$0xff]  }
 0x102   : > { %1692 = vmatpush1.bf16.msra.mxu0 %v2372_v9  ;;  %1730 = vmatprep.subr.bf16.mxu1 %v2365_v12  ;;  %v2440_v33 = vld [vmem:[#allocation11 + $0x12c] ss:$16 sps:$4 sm:$0xff]   ;;  %v2438_v34 = vld [vmem:[#allocation11 + $0x128] ss:$16 sps:$4 sm:$0xff]  }
 0x103   : > { %1693 = vmatprep.subr.bf16.mxu0 %v2380_v58  ;;  %v2425_v23 = vld [vmem:[#allocation11 + $0x38c] ss:$16 sps:$4 sm:$0xff]   ;;  %v2423_v10 = vld [vmem:[#allocation11 + $0x388] ss:$16 sps:$4 sm:$0xff]  }
 0x104   : > { %v2446_v20 = vld [vmem:[#allocation11 + $0x10c] ss:$16 sps:$4 sm:$0xff]   ;;  %v2444_v1 = vld [vmem:[#allocation11 + $0x108] ss:$16 sps:$4 sm:$0xff]  }
 0x105   : > { %1731 = vmatpush1.bf16.msra.mxu1 %v2363_v15  ;;  %v2431_v19 = vld [vmem:[#allocation11 + $0x36c] ss:$16 sps:$4 sm:$0xff]   ;;  %v2429_v37 = vld [vmem:[#allocation11 + $0x368] ss:$16 sps:$4 sm:$0xff]  }
 0x106   : > { %1694 = vmatpush1.bf16.msra.mxu0 %v2378_v57  ;;  %1732 = vmatprep.subr.bf16.mxu1 %v2371_v2  ;;  %v2437_v55 = vld [vmem:[#allocation11 + $0x34c] ss:$16 sps:$4 sm:$0xff]   ;;  %v2435_v63 = vld [vmem:[#allocation11 + $0x348] ss:$16 sps:$4 sm:$0xff]  }
 0x107   : > { %1695 = vmatprep.subr.bf16.mxu0 %v2386_v16  ;;  %v2443_v27 = vld [vmem:[#allocation11 + $0x32c] ss:$16 sps:$4 sm:$0xff]   ;;  %v2441_v9 = vld [vmem:[#allocation11 + $0x328] ss:$16 sps:$4 sm:$0xff]  }
 0x108   : > { %v2449_v0 = vld [vmem:[#allocation11 + $0x30c] ss:$16 sps:$4 sm:$0xff]   ;;  %v2447_v58 = vld [vmem:[#allocation11 + $0x308] ss:$16 sps:$4 sm:$0xff]  }
 0x109   : > { %1733 = vmatpush1.bf16.msra.mxu1 %v2369_v26 }
 0x10a   : > { %1696 = vmatpush1.bf16.msra.mxu0 %v2384_v54  ;;  %1734 = vmatprep.subr.bf16.mxu1 %v2377_v44 }
 0x10b   : > { %1697 = vmatprep.subr.bf16.mxu0 %v2392_v56 }
 0x10d   : > { %1735 = vmatpush1.bf16.msra.mxu1 %v2375_v13 }
 0x10e   : > { %1698 = vmatpush1.bf16.msra.mxu0 %v2390_v45  ;;  %1736 = vmatprep.subr.bf16.mxu1 %v2383_v31 }
 0x10f   : > { %1699 = vmatprep.subr.bf16.mxu0 %v2398_v11 }
 0x111   : > { %1737 = vmatpush1.bf16.msra.mxu1 %v2381_v49 }
 0x112   : > { %1700 = vmatpush1.bf16.msra.mxu0 %v2396_v52  ;;  %1738 = vmatprep.subr.bf16.mxu1 %v2389_v4 }
 0x113   : > { %1701 = vmatprep.subr.bf16.mxu0 %v2404_v48 }
 0x115   : > { %1739 = vmatpush1.bf16.msra.mxu1 %v2387_v59 }
 0x116   : > { %1702 = vmatpush2.bf16.msra.mxu0 %v2402_v50  ;;  %1740 = vmatprep.subr.bf16.mxu1 %v2395_v61 }
 0x117   : > { %1703 = vmatprep.subr.bf16.mxu0 %v2410_v53 }
 0x119   : > { %1741 = vmatpush1.bf16.msra.mxu1 %v2393_v46 }
 0x11a   : > { %1704 = vmatpush2.bf16.msra.mxu0 %v2408_v3  ;;  %1742 = vmatprep.subr.bf16.mxu1 %v2401_v47 }
 0x11b   : > { %1705 = vmatprep.subr.bf16.mxu0 %v2416_v8 }
 0x11d   : > { %1743 = vmatpush1.bf16.msra.mxu1 %v2399_v42 }
 0x11e   : > { %1706 = vmatpush2.bf16.msra.mxu0 %v2414_v62  ;;  %1744 = vmatprep.subr.bf16.mxu1 %v2407_v6 }
 0x11f   : > { %1707 = vmatprep.subr.bf16.mxu0 %v2422_v24 }
 0x121   : > { %1745 = vmatpush2.bf16.msra.mxu1 %v2405_v51 }
 0x122   : > { %1708 = vmatpush2.bf16.msra.mxu0 %v2420_v22  ;;  %1746 = vmatprep.subr.bf16.mxu1 %v2413_v30 }
 0x123   : > { %1709 = vmatprep.subr.bf16.mxu0 %v2428_v25 }
 0x125   : > { %1747 = vmatpush2.bf16.msra.mxu1 %v2411_v32 }
 0x126   : > { %1710 = vmatpush2.bf16.msra.mxu0 %v2426_v43  ;;  %1748 = vmatprep.subr.bf16.mxu1 %v2419_v29 }
 0x127   : > { %1711 = vmatprep.subr.bf16.mxu0 %v2434_v14 }
 0x129   : > { %1749 = vmatpush2.bf16.msra.mxu1 %v2417_v40 }
 0x12a   : > { %1712 = vmatpush2.bf16.msra.mxu0 %v2432_v38  ;;  %1750 = vmatprep.subr.bf16.mxu1 %v2425_v23 }
 0x12b   : > { %1713 = vmatprep.subr.bf16.mxu0 %v2440_v33 }
 0x12d   : > { %1751 = vmatpush2.bf16.msra.mxu1 %v2423_v10 }
 0x12e   : > { %1714 = vmatpush2.bf16.msra.mxu0 %v2438_v34  ;;  %1752 = vmatprep.subr.bf16.mxu1 %v2431_v19 }
 0x12f   : > { %1715 = vmatprep.subr.bf16.mxu0 %v2446_v20 }
 0x131   : > { %1753 = vmatpush2.bf16.msra.mxu1 %v2429_v37 }
 0x132   : > { %1716 = vmatpush2.bf16.msra.mxu0 %v2444_v1  ;;  %1754 = vmatprep.subr.bf16.mxu1 %v2437_v55 }
 0x135   : > { %1718 = vmatmul.mubr.bf16.vlgmr.msra.gmra.mxu0 %v3312_v18  ;;  %1755 = vmatpush2.bf16.msra.mxu1 %v2435_v63 }
 0x136   : > { %1756 = vmatprep.subr.bf16.mxu1 %v2443_v27 }
 0x139   : > { %1757 = vmatpush2.bf16.msra.mxu1 %v2441_v9 }
 0x13a   : > { %1758 = vmatprep.subr.bf16.mxu1 %v2449_v0 }
 0x13d   : > { %1759 = vmatpush2.bf16.msra.mxu1 %v2447_v58 }
 0x140   : > { %1761 = vmatmul.mubr.bf16.vlgmr.msra.gmra.mxu1 %v3326_v39 }
 0x1b5   : > { %v1633_v41 = vpop.f32.mrf.mxu0 }
 0x1b6   : > { %v1634_v16 = vadd.f32 %v1633_v41, %v3136_v35 }
 0x1b7   : > { %v1635_v12 = vpop.f32.mrf.mxu0 }
 0x1b8   : > { %v1636_v15 = vadd.f32 %v1635_v12, %v3045_v60 }
 0x1b9   : > { %v1637_v57 = vpop.f32.mrf.mxu0 }
 0x1ba   : > { %v1638_v56 = vadd.f32 %v1637_v57, %v3139_v36 }
 0x1bb   : > { %v1639_v18 = vpop.f32.mrf.mxu0 }
 0x1bc   : > { %v1640_v35 = vadd.f32 %v1639_v18, %v3094_v17 }
 0x1c0   : > { %v1676_v2 = vpop.f32.mrf.mxu1 }
 0x1c1   : > { %v1677_v54 = vadd.f32 %v1676_v2, %v1634_v16 }
 0x1c2   : > { %v1678_v26 = vpop.f32.mrf.mxu1 }
 0x1c3   : > { %1771 = vst [vmem:[%s3337_s8] sm:$0xff] %v1677_v54  ;;  %v1679_v39 = vadd.f32 %v1678_v26, %v1636_v15 }
 0x1c4   : > { %v1680_v60 = vpop.f32.mrf.mxu1 }
 0x1c5   : > { %1772 = vst [vmem:[%s3337_s8 + $0x8] sm:$0xff] %v1679_v39  ;;  %v1681_v44 = vadd.f32 %v1680_v60, %v1638_v56 }
 0x1c6   : > { %v1682_v45 = vpop.f32.mrf.mxu1 }
 0x1c7   : > { %1775 = vst [vmem:[%s3337_s8 + $0x20] sm:$0xff] %v1681_v44  ;;  %v1683_v36 = vadd.f32 %v1682_v45, %v1640_v35 }
 0x1c9   : > { %1776 = vst [vmem:[%s3337_s8 + $0x28] sm:$0xff] %v1683_v36 }
 0x1f5   : > { %v1719_v11 = vpop.f32.mrf.mxu0 }
 0x1f6   : > { %v1720_v52 = vadd.f32 %v1719_v11, %v3196_v5 }
 0x1f7   : > { %v1721_v13 = vpop.f32.mrf.mxu0 }
 0x1f8   : > { %v1722_v48 = vadd.f32 %v1721_v13, %v3107_v21 }
 0x1f9   : > { %v1723_v31 = vpop.f32.mrf.mxu0 }
 0x1fa   : > { %v1724_v50 = vadd.f32 %v1723_v31, %v3270_v7 }
 0x1fb   : > { %v1725_v49 = vpop.f32.mrf.mxu0 }
 0x1fc   : > { %v1726_v5 = vadd.f32 %v1725_v49, %v3124_v28 }
 0x200   : > { %v1762_v17 = vpop.f32.mrf.mxu1 }
 0x201   : > { %v1763_v4 = vadd.f32 %v1762_v17, %v1720_v52 }
 0x202   : > { %v1764_v53 = vpop.f32.mrf.mxu1 }
 0x203   : > { %1773 = vst [vmem:[%s3337_s8 + $0x10] sm:$0xff] %v1763_v4  ;;  %v1765_v59 = vadd.f32 %v1764_v53, %v1722_v48 }
 0x204   : > { %v1766_v61 = vpop.f32.mrf.mxu1 }
 0x205   : > { %1774 = vst [vmem:[%s3337_s8 + $0x18] sm:$0xff] %v1765_v59  ;;  %v1767_v21 = vadd.f32 %v1766_v61, %v1724_v50 }
 0x206   : > { %v1768_v7 = vpop.f32.mrf.mxu1 }
 0x207   : > { %1777 = vst [vmem:[%s3337_s8 + $0x30] sm:$0xff] %v1767_v21  ;;  %v1769_v3 = vadd.f32 %v1768_v7, %v1726_v5 }
 0x209   : > { %1778 = vst [vmem:[%s3337_s8 + $0x38] sm:$0xff] %v1769_v3 }
 0x20a   : > { %2599 = shalt.err (!%p2596_p1)
}
 0x20b   : > { %s2600_s22 = scalar_lea.hbm %s3359_s15, 1024  ;;  %s2604_s6 = scalar_lea.hbm %s3507_s13, 6144 }
 0x20c   : > { %p2601_p3 = scmp.ne.s32.totalorder %s3359_s15, %s2600_s22  ;;  %p2605_p5 = scmp.lt.s32.totalorder %s3359_s15, %s3507_s13 }
 0x20d   : > { %p2606_p13 = scmp.lt.s32.totalorder %s2604_s6, %s2600_s22 }
 0x20e   : > { %p2602_p6 = pnand %p2601_p3, %p3508_p7 }
 0x20f   : > { %p2607_p12 = por %p2606_p13, %p2605_p5 }
 0x210   : > { %p2603_p9 = pneg %p2602_p6 }
 0x212   : > { %p2608_p0 = pnand %p2607_p12, %p2603_p9 }
 0x214   : > { %2611 = shalt.err (!%p2608_p0)
}
 0x215   : > { %s2726_s2 = smov 512   ;;  %s2727_s25 = smov 32  }
 0x216   : > { %2133 = dma.vmem_to_hbm [thread:$0]  (%p3508_p7), %s3352_s1, 1024, %s3359_s15, %s1780_s23, %s2726_s2, %s2726_s2, %s2727_s25  }
 0x217 PF: > { %s3509_s8 = sld [smem:[#allocation22_spill]] }
 0x218   : > { %s3510_s9 = sld [smem:[#allocation19_spill]] }
 0x219   : > { %s3511_s14 = sld [smem:[#allocation25_spill]] }
 0x21d   : > { %p2161_p2 = scmp.ge.s32.totalorder %s3509_s8, 2 }
 0x21e   : > { %s1811_s29 = sand.u32 1, %s3510_s9  }
 0x21f   : > { %p3512_p4 = scmp.ne.s32.totalorder %s3511_s14, 0  ;;  %s1812_s21 = scalar_lea.sflag [#allocation5], %s1811_s29 }
 0x221   : > { %p2153_p8 = pnand %p2161_p2, %p3512_p4 }
 0x223   : > { %p2154_p10 = pneg %p2153_p8 }
 0x225   : > { %2669 = dma.done.wait (%p2154_p10), %s1812_s21, 1024  }
 0x226   : > { %2671 = vsyncadd (%p2154_p10), %s1812_s21, 4294966272  ;;  %s27_s8 = sadd.s32 1, %s3509_s8   ;;  %s3513_s23 = sld [smem:[#allocation17_spill]] }
 0x227   : > { %p24_p11 = scmp.ge.s32.totalorder %s27_s8, 8   ;;  %s3514_s24 = sld [smem:[#allocation18_spill]] }
 0x228   : > { %s3515_s25 = sld [smem:[#allocation31_spill]]  ;;  %s3519_s26 = smov %s2690_s27 }
 0x229   : > { %s3516_s1 = sld [smem:[#allocation28_spill]]  ;;  %s3520_s27 = smov %s2694_s28 }
 0x22a   : > { %s3517_s3 = sld [smem:[#allocation26_spill]]  ;;  %s3522_s5 = smov %s2706_s30 }
 0x22b   : > { %s3518_s11 = sld [smem:[#allocation27_spill]]  ;;  %s3523_s29 = smov %s2710_s7 }
 0x22d   :  { %26 = sbr.rel (!%p24_p11) target bundleno = 18 (0x12), region = 127 }
 0x22f   : > { %s3521_s28 = smov %s3516_s1 }
 0x230   : > { %s3524_s30 = smov %s3517_s3 }
 0x231   : > { %s3525_s7 = smov %s3518_s11 }
 0x232   :  { %1817 = vsyncpa [#allocation4], 1 }
 0x233   :  { %1819 = vsyncpa [#allocation4 + $0x1], 1 }
 0x234   :  { %1820 = vsyncpa [#allocation7], 1 }
 0x235   :  { %1822 = vsyncpa [#allocation7 + $0x1], 1 }
 0x236   :  { %1823 = vsyncpa [#allocation10], 1 }
 0x237   :  { %1824 = vsyncpa [#allocation5], 1 }
 0x238   :  { %1826 = vsyncpa [#allocation5 + $0x1], 1 }

</bundles_post_ra>
